<compile_context>
chip_gen: v7x
topology: tpu7x:2x2x1
jax: 0.10.0
libtpu: 0.0.40
codegen_flags: <defaults>
</compile_context>

<pallas_src>
import jax
import jax.numpy as jnp
from jax.experimental import pallas as pl
from jax.experimental.pallas import tpu as pltpu

HIDDEN = 5
INPUT = 1
NGATES = 4  # PyTorch LSTM gate order: i, f, g, o
LANE = 128


def lstm_fc_kernel(x_ref, wih_ref, whh_ref, b_ref, wfc_ref, bfc_ref,
                   out_ref, h_ref, c_ref):
    # x_ref   : (s_tile, bt)   seq-chunk of scalar inputs, batch on lanes
    # wih_ref : (H, 4)         wih[j, g]       = W_ih[g*H + j, 0]
    # whh_ref : (H, 4H)        whh[j, g*H + k] = W_hh[g*H + j, k]
    # b_ref   : (H, 4)         (bias_ih + bias_hh) per gate, column-major
    # wfc_ref : (H, 1)         fc1.weight
    # bfc_ref : (1, 1)         fc1.bias (SMEM scalar)
    # out_ref : (1, bt)        lane-dense output row
    # h_ref/c_ref : (H, bt)    VMEM scratch carrying state across seq chunks
    s_tile, bt = x_ref.shape
    H = wih_ref.shape[0]
    j = pl.program_id(1)

    @pl.when(j == 0)
    def _():
        h_ref[...] = jnp.zeros_like(h_ref)
        c_ref[...] = jnp.zeros_like(c_ref)

    wih = wih_ref[...]        # (H, 4)
    whh = whh_ref[...]        # (H, 4H)
    bias = b_ref[...]         # (H, 4)

    # ---- Hoisted, loop-invariant lane-broadcasts of the weight columns ----
    wih_b = [jnp.broadcast_to(wih[:, g:g + 1], (H, bt)) for g in range(NGATES)]
    bias_b = [jnp.broadcast_to(bias[:, g:g + 1], (H, bt)) for g in range(NGATES)]
    whh_b = [[jnp.broadcast_to(whh[:, g * H + k:g * H + k + 1], (H, bt))
              for k in range(H)] for g in range(NGATES)]

    x = x_ref[...]            # (s_tile, bt)
    h = h_ref[...]            # (H, bt)
    c = c_ref[...]            # (H, bt)

    # ---- Recurrence: unrolled within the chunk; VPU broadcast-FMAs only ----
    for t in range(s_tile):
        x_b = jnp.broadcast_to(x[t:t + 1, :], (H, bt))        # sublane bcast
        g_i = wih_b[0] * x_b + bias_b[0]
        g_f = wih_b[1] * x_b + bias_b[1]
        g_g = wih_b[2] * x_b + bias_b[2]
        g_o = wih_b[3] * x_b + bias_b[3]
        for k in range(H):
            h_k = jnp.broadcast_to(h[k:k + 1, :], (H, bt))    # shared by gates
            g_i = g_i + whh_b[0][k] * h_k
            g_f = g_f + whh_b[1][k] * h_k
            g_g = g_g + whh_b[2][k] * h_k
            g_o = g_o + whh_b[3][k] * h_k
        i_t = jax.nn.sigmoid(g_i)
        f_t = jax.nn.sigmoid(g_f)
        n_t = jnp.tanh(g_g)
        o_t = jax.nn.sigmoid(g_o)
        c = f_t * c + i_t * n_t
        h = o_t * jnp.tanh(c)

    h_ref[...] = h
    c_ref[...] = c

    # ---- Last chunk: ReLU + Linear(H -> 1) as a sublane reduction ----------
    @pl.when(j == pl.num_programs(1) - 1)
    def _():
        h_relu = jnp.maximum(h, 0.0)
        wfc_b = jnp.broadcast_to(wfc_ref[...], (H, bt))
        out = jnp.sum(h_relu * wfc_b, axis=0, keepdims=True) + bfc_ref[0, 0]
        out_ref[...] = out.astype(out_ref.dtype)              # (1, bt) lane-dense


def _choose_batch_tiling(B):
    """Return (padded_B, bt). Small batches: one full-array tile; large
    batches: pad to a multiple of 128 and tile with >= 2 grid steps."""
    if B <= LANE:
        return B, B
    Bp = ((B + LANE - 1) // LANE) * LANE
    bt = min(512, Bp // 2)
    bt = max(LANE, (bt // LANE) * LANE)
    while Bp % bt:
        bt -= LANE
    return Bp, bt


def _choose_seq_tiling(S):
    """Chunk the sequence only when the chunk (multiple of 8) divides S;
    otherwise run a single full-length chunk."""
    if S > 16 and S % 8 == 0:
        for cand in (16, 8):
            if S % cand == 0:
                return cand
    return S


def lstm_model_forward(x, params):
    """x: (batch, seq, 1) float32, like the PyTorch module (batch_first)."""
    B, S, I = x.shape
    assert I == INPUT
    H = HIDDEN

    # (B, S, 1) -> (S, B): per-timestep input is a lane-dense row.
    x2 = x.reshape(B, S).T

    Bp, bt = _choose_batch_tiling(B)
    if Bp != B:
        x2 = jnp.pad(x2, ((0, 0), (0, Bp - B)))
    s_tile = _choose_seq_tiling(S)
    n_bt = Bp // bt
    n_sc = S // s_tile

    # One-time, tiny parameter re-layouts (outside the kernel):
    wih = params["weight_ih"].reshape(NGATES, H).T                    # (H, 4)
    whh = (params["weight_hh"].reshape(NGATES, H, H)
           .transpose(1, 0, 2).reshape(H, NGATES * H))                # (H, 4H)
    b = (params["bias_ih"] + params["bias_hh"]).reshape(NGATES, H).T  # (H, 4)
    wfc = params["fc_w"].reshape(H, 1)                                # (H, 1)
    bfc = params["fc_b"].reshape(1, 1)                                # (1, 1)

    out = pl.pallas_call(
        lstm_fc_kernel,
        out_shape=jax.ShapeDtypeStruct((1, Bp), jnp.float32),
        grid=(n_bt, n_sc),
        in_specs=[
            pl.BlockSpec((s_tile, bt), lambda i, j: (j, i)),      # x chunk
            pl.BlockSpec((H, NGATES), lambda i, j: (0, 0)),       # wih (resident)
            pl.BlockSpec((H, NGATES * H), lambda i, j: (0, 0)),   # whh (resident)
            pl.BlockSpec((H, NGATES), lambda i, j: (0, 0)),       # fused bias
            pl.BlockSpec((H, 1), lambda i, j: (0, 0)),            # fc weight
            pl.BlockSpec(memory_space=pltpu.MemorySpace.SMEM),    # fc bias scalar
        ],
        out_specs=pl.BlockSpec((1, bt), lambda i, j: (0, i)),
        scratch_shapes=[pltpu.VMEM((H, bt), jnp.float32),         # h carry
                        pltpu.VMEM((H, bt), jnp.float32)],        # c carry
        compiler_params=pltpu.CompilerParams(
            dimension_semantics=("parallel", "arbitrary")),
    )(x2, wih, whh, b, wfc, bfc)

    return out[:, :B].reshape(B, 1)


def init_params(key):
    # Deterministic init mimicking PyTorch's U(-1/sqrt(H), 1/sqrt(H)).
    k = 1.0 / jnp.sqrt(jnp.float32(HIDDEN))
    keys = jax.random.split(key, 6)
    u = lambda kk, shape: jax.random.uniform(kk, shape, jnp.float32, -k, k)
    return {
        "weight_ih": u(keys[0], (NGATES * HIDDEN, INPUT)),
        "weight_hh": u(keys[1], (NGATES * HIDDEN, HIDDEN)),
        "bias_ih": u(keys[2], (NGATES * HIDDEN,)),
        "bias_hh": u(keys[3], (NGATES * HIDDEN,)),
        "fc_w": u(keys[4], (1, HIDDEN)),
        "fc_b": u(keys[5], (1,)),
    }


def reference_forward(x, p):
    """Pure-JAX reference with identical semantics (sanity check)."""
    B, S, _ = x.shape
    H = HIDDEN
    h = jnp.zeros((B, H), jnp.float32)
    c = jnp.zeros((B, H), jnp.float32)
    for t in range(S):
        x_t = x[:, t, :]                                   # (B, 1)
        gates = x_t @ p["weight_ih"].T + h @ p["weight_hh"].T \
            + p["bias_ih"] + p["bias_hh"]
        i_g = jax.nn.sigmoid(gates[:, 0 * H:1 * H])
        f_g = jax.nn.sigmoid(gates[:, 1 * H:2 * H])
        g_g = jnp.tanh(gates[:, 2 * H:3 * H])
        o_g = jax.nn.sigmoid(gates[:, 3 * H:4 * H])
        c = f_g * c + i_g * g_g
        h = o_g * jnp.tanh(c)
    return jnp.maximum(h, 0.0) @ p["fc_w"].T + p["fc_b"]


if __name__ == "__main__":
    key = jax.random.PRNGKey(0)
    k_param, k_x = jax.random.split(key)

    batch, seq = 2, 8
    x = jax.random.normal(k_x, (batch, seq, INPUT), jnp.float32)
    params = init_params(k_param)

    out = lstm_model_forward(x, params)
    out = jax.block_until_ready(out)
    assert out.shape == (batch, 1)

    ref = reference_forward(x, params)
    assert jnp.allclose(out, ref, atol=1e-5, rtol=1e-5)

    print("KERNEL_OK")
</pallas_src>

<mosaic_0001>
module attributes {stable_mosaic.version = 11 : i64} {
  func.func @lstm_fc_kernel(%arg0: i32, %arg1: i32, %arg2: memref<8x2xf32, #tpu.memory_space<vmem>>, %arg3: memref<5x4xf32, #tpu.memory_space<vmem>>, %arg4: memref<5x20xf32, #tpu.memory_space<vmem>>, %arg5: memref<5x4xf32, #tpu.memory_space<vmem>>, %arg6: memref<5x1xf32, #tpu.memory_space<vmem>>, %arg7: memref<1x1xf32, #tpu.memory_space<smem>>, %arg8: memref<1x2xf32, #tpu.memory_space<vmem>>, %arg9: memref<5x2xf32, #tpu.memory_space<vmem>>, %arg10: memref<5x2xf32, #tpu.memory_space<vmem>>) attributes {dimension_semantics = [#tpu.dimension_semantics<parallel>, #tpu.dimension_semantics<arbitrary>], iteration_bounds = array<i64: 1, 1>, scalar_prefetch = 0 : i64, scratch_operands = 2 : i64, tpu.core_type = #tpu.core_type<tc>, window_params = [{transform_indices = @transform_0, window_bounds = array<i64: 8, 2>}, {pipeline_mode = #tpu.pipeline_mode<synchronous>, transform_indices = @transform_1, window_bounds = array<i64: 5, 4>}, {pipeline_mode = #tpu.pipeline_mode<synchronous>, transform_indices = @transform_2, window_bounds = array<i64: 5, 20>}, {pipeline_mode = #tpu.pipeline_mode<synchronous>, transform_indices = @transform_3, window_bounds = array<i64: 5, 4>}, {pipeline_mode = #tpu.pipeline_mode<synchronous>, transform_indices = @transform_4, window_bounds = array<i64: 5, 1>}, {transform_indices = @transform_5, window_bounds = array<i64: 1, 1>}, {transform_indices = @transform_6, window_bounds = array<i64: 1, 2>}]} {
    %c0_i32 = arith.constant 0 : i32
    %0 = arith.cmpi eq, %arg1, %c0_i32 : i32
    %1 = arith.extui %0 : i1 to i32
    %c0_i32_0 = arith.constant 0 : i32
    %2 = arith.cmpi ne, %1, %c0_i32_0 : i32
    scf.if %2 {
      %cst_41 = arith.constant 0.000000e+00 : f32
      %794 = vector.broadcast %cst_41 : f32 to vector<5x2xf32>
      %c0_42 = arith.constant 0 : index
      %c0_43 = arith.constant 0 : index
      %795 = vector.load %arg9[%c0_42, %c0_43] : memref<5x2xf32, #tpu.memory_space<vmem>>, vector<5x2xf32>
      tpu.vector_store %arg9[%c0_42, %c0_43], %794 {strides = array<i32>} : memref<5x2xf32, #tpu.memory_space<vmem>>, vector<5x2xf32>,
      %cst_44 = arith.constant 0.000000e+00 : f32
      %796 = vector.broadcast %cst_44 : f32 to vector<5x2xf32>
      %c0_45 = arith.constant 0 : index
      %c0_46 = arith.constant 0 : index
      %797 = vector.load %arg10[%c0_45, %c0_46] : memref<5x2xf32, #tpu.memory_space<vmem>>, vector<5x2xf32>
      tpu.vector_store %arg10[%c0_45, %c0_46], %796 {strides = array<i32>} : memref<5x2xf32, #tpu.memory_space<vmem>>, vector<5x2xf32>,
    } else {
    }
    %c0 = arith.constant 0 : index
    %c0_1 = arith.constant 0 : index
    %3 = vector.load %arg3[%c0, %c0_1] : memref<5x4xf32, #tpu.memory_space<vmem>>, vector<5x4xf32>
    %c0_2 = arith.constant 0 : index
    %c0_3 = arith.constant 0 : index
    %4 = vector.load %arg4[%c0_2, %c0_3] : memref<5x20xf32, #tpu.memory_space<vmem>>, vector<5x20xf32>
    %c0_4 = arith.constant 0 : index
    %c0_5 = arith.constant 0 : index
    %5 = vector.load %arg5[%c0_4, %c0_5] : memref<5x4xf32, #tpu.memory_space<vmem>>, vector<5x4xf32>
    %6 = vector.extract_strided_slice %3 {offsets = [0, 0], sizes = [5, 1], strides = [1, 1]} : vector<5x4xf32> to vector<5x1xf32>
    %7 = vector.shape_cast %6 : vector<5x1xf32> to vector<5x1xf32>
    %8 = vector.broadcast %7 : vector<5x1xf32> to vector<5x2xf32>
    %9 = vector.extract_strided_slice %3 {offsets = [0, 1], sizes = [5, 1], strides = [1, 1]} : vector<5x4xf32> to vector<5x1xf32>
    %10 = vector.shape_cast %9 : vector<5x1xf32> to vector<5x1xf32>
    %11 = vector.broadcast %10 : vector<5x1xf32> to vector<5x2xf32>
    %12 = vector.extract_strided_slice %3 {offsets = [0, 2], sizes = [5, 1], strides = [1, 1]} : vector<5x4xf32> to vector<5x1xf32>
    %13 = vector.shape_cast %12 : vector<5x1xf32> to vector<5x1xf32>
    %14 = vector.broadcast %13 : vector<5x1xf32> to vector<5x2xf32>
    %15 = vector.extract_strided_slice %3 {offsets = [0, 3], sizes = [5, 1], strides = [1, 1]} : vector<5x4xf32> to vector<5x1xf32>
    %16 = vector.shape_cast %15 : vector<5x1xf32> to vector<5x1xf32>
    %17 = vector.broadcast %16 : vector<5x1xf32> to vector<5x2xf32>
    %18 = vector.extract_strided_slice %5 {offsets = [0, 0], sizes = [5, 1], strides = [1, 1]} : vector<5x4xf32> to vector<5x1xf32>
    %19 = vector.shape_cast %18 : vector<5x1xf32> to vector<5x1xf32>
    %20 = vector.broadcast %19 : vector<5x1xf32> to vector<5x2xf32>
    %21 = vector.extract_strided_slice %5 {offsets = [0, 1], sizes = [5, 1], strides = [1, 1]} : vector<5x4xf32> to vector<5x1xf32>
    %22 = vector.shape_cast %21 : vector<5x1xf32> to vector<5x1xf32>
    %23 = vector.broadcast %22 : vector<5x1xf32> to vector<5x2xf32>
    %24 = vector.extract_strided_slice %5 {offsets = [0, 2], sizes = [5, 1], strides = [1, 1]} : vector<5x4xf32> to vector<5x1xf32>
    %25 = vector.shape_cast %24 : vector<5x1xf32> to vector<5x1xf32>
    %26 = vector.broadcast %25 : vector<5x1xf32> to vector<5x2xf32>
    %27 = vector.extract_strided_slice %5 {offsets = [0, 3], sizes = [5, 1], strides = [1, 1]} : vector<5x4xf32> to vector<5x1xf32>
    %28 = vector.shape_cast %27 : vector<5x1xf32> to vector<5x1xf32>
    %29 = vector.broadcast %28 : vector<5x1xf32> to vector<5x2xf32>
    %30 = vector.extract_strided_slice %4 {offsets = [0, 0], sizes = [5, 1], strides = [1, 1]} : vector<5x20xf32> to vector<5x1xf32>
    %31 = vector.shape_cast %30 : vector<5x1xf32> to vector<5x1xf32>
    %32 = vector.broadcast %31 : vector<5x1xf32> to vector<5x2xf32>
    %33 = vector.extract_strided_slice %4 {offsets = [0, 1], sizes = [5, 1], strides = [1, 1]} : vector<5x20xf32> to vector<5x1xf32>
    %34 = vector.shape_cast %33 : vector<5x1xf32> to vector<5x1xf32>
    %35 = vector.broadcast %34 : vector<5x1xf32> to vector<5x2xf32>
    %36 = vector.extract_strided_slice %4 {offsets = [0, 2], sizes = [5, 1], strides = [1, 1]} : vector<5x20xf32> to vector<5x1xf32>
    %37 = vector.shape_cast %36 : vector<5x1xf32> to vector<5x1xf32>
    %38 = vector.broadcast %37 : vector<5x1xf32> to vector<5x2xf32>
    %39 = vector.extract_strided_slice %4 {offsets = [0, 3], sizes = [5, 1], strides = [1, 1]} : vector<5x20xf32> to vector<5x1xf32>
    %40 = vector.shape_cast %39 : vector<5x1xf32> to vector<5x1xf32>
    %41 = vector.broadcast %40 : vector<5x1xf32> to vector<5x2xf32>
    %42 = vector.extract_strided_slice %4 {offsets = [0, 4], sizes = [5, 1], strides = [1, 1]} : vector<5x20xf32> to vector<5x1xf32>
    %43 = vector.shape_cast %42 : vector<5x1xf32> to vector<5x1xf32>
    %44 = vector.broadcast %43 : vector<5x1xf32> to vector<5x2xf32>
    %45 = vector.extract_strided_slice %4 {offsets = [0, 5], sizes = [5, 1], strides = [1, 1]} : vector<5x20xf32> to vector<5x1xf32>
    %46 = vector.shape_cast %45 : vector<5x1xf32> to vector<5x1xf32>
    %47 = vector.broadcast %46 : vector<5x1xf32> to vector<5x2xf32>
    %48 = vector.extract_strided_slice %4 {offsets = [0, 6], sizes = [5, 1], strides = [1, 1]} : vector<5x20xf32> to vector<5x1xf32>
    %49 = vector.shape_cast %48 : vector<5x1xf32> to vector<5x1xf32>
    %50 = vector.broadcast %49 : vector<5x1xf32> to vector<5x2xf32>
    %51 = vector.extract_strided_slice %4 {offsets = [0, 7], sizes = [5, 1], strides = [1, 1]} : vector<5x20xf32> to vector<5x1xf32>
    %52 = vector.shape_cast %51 : vector<5x1xf32> to vector<5x1xf32>
    %53 = vector.broadcast %52 : vector<5x1xf32> to vector<5x2xf32>
    %54 = vector.extract_strided_slice %4 {offsets = [0, 8], sizes = [5, 1], strides = [1, 1]} : vector<5x20xf32> to vector<5x1xf32>
    %55 = vector.shape_cast %54 : vector<5x1xf32> to vector<5x1xf32>
    %56 = vector.broadcast %55 : vector<5x1xf32> to vector<5x2xf32>
    %57 = vector.extract_strided_slice %4 {offsets = [0, 9], sizes = [5, 1], strides = [1, 1]} : vector<5x20xf32> to vector<5x1xf32>
    %58 = vector.shape_cast %57 : vector<5x1xf32> to vector<5x1xf32>
    %59 = vector.broadcast %58 : vector<5x1xf32> to vector<5x2xf32>
    %60 = vector.extract_strided_slice %4 {offsets = [0, 10], sizes = [5, 1], strides = [1, 1]} : vector<5x20xf32> to vector<5x1xf32>
    %61 = vector.shape_cast %60 : vector<5x1xf32> to vector<5x1xf32>
    %62 = vector.broadcast %61 : vector<5x1xf32> to vector<5x2xf32>
    %63 = vector.extract_strided_slice %4 {offsets = [0, 11], sizes = [5, 1], strides = [1, 1]} : vector<5x20xf32> to vector<5x1xf32>
    %64 = vector.shape_cast %63 : vector<5x1xf32> to vector<5x1xf32>
    %65 = vector.broadcast %64 : vector<5x1xf32> to vector<5x2xf32>
    %66 = vector.extract_strided_slice %4 {offsets = [0, 12], sizes = [5, 1], strides = [1, 1]} : vector<5x20xf32> to vector<5x1xf32>
    %67 = vector.shape_cast %66 : vector<5x1xf32> to vector<5x1xf32>
    %68 = vector.broadcast %67 : vector<5x1xf32> to vector<5x2xf32>
    %69 = vector.extract_strided_slice %4 {offsets = [0, 13], sizes = [5, 1], strides = [1, 1]} : vector<5x20xf32> to vector<5x1xf32>
    %70 = vector.shape_cast %69 : vector<5x1xf32> to vector<5x1xf32>
    %71 = vector.broadcast %70 : vector<5x1xf32> to vector<5x2xf32>
    %72 = vector.extract_strided_slice %4 {offsets = [0, 14], sizes = [5, 1], strides = [1, 1]} : vector<5x20xf32> to vector<5x1xf32>
    %73 = vector.shape_cast %72 : vector<5x1xf32> to vector<5x1xf32>
    %74 = vector.broadcast %73 : vector<5x1xf32> to vector<5x2xf32>
    %75 = vector.extract_strided_slice %4 {offsets = [0, 15], sizes = [5, 1], strides = [1, 1]} : vector<5x20xf32> to vector<5x1xf32>
    %76 = vector.shape_cast %75 : vector<5x1xf32> to vector<5x1xf32>
    %77 = vector.broadcast %76 : vector<5x1xf32> to vector<5x2xf32>
    %78 = vector.extract_strided_slice %4 {offsets = [0, 16], sizes = [5, 1], strides = [1, 1]} : vector<5x20xf32> to vector<5x1xf32>
    %79 = vector.shape_cast %78 : vector<5x1xf32> to vector<5x1xf32>
    %80 = vector.broadcast %79 : vector<5x1xf32> to vector<5x2xf32>
    %81 = vector.extract_strided_slice %4 {offsets = [0, 17], sizes = [5, 1], strides = [1, 1]} : vector<5x20xf32> to vector<5x1xf32>
    %82 = vector.shape_cast %81 : vector<5x1xf32> to vector<5x1xf32>
    %83 = vector.broadcast %82 : vector<5x1xf32> to vector<5x2xf32>
    %84 = vector.extract_strided_slice %4 {offsets = [0, 18], sizes = [5, 1], strides = [1, 1]} : vector<5x20xf32> to vector<5x1xf32>
    %85 = vector.shape_cast %84 : vector<5x1xf32> to vector<5x1xf32>
    %86 = vector.broadcast %85 : vector<5x1xf32> to vector<5x2xf32>
    %87 = vector.extract_strided_slice %4 {offsets = [0, 19], sizes = [5, 1], strides = [1, 1]} : vector<5x20xf32> to vector<5x1xf32>
    %88 = vector.shape_cast %87 : vector<5x1xf32> to vector<5x1xf32>
    %89 = vector.broadcast %88 : vector<5x1xf32> to vector<5x2xf32>
    %c0_6 = arith.constant 0 : index
    %c0_7 = arith.constant 0 : index
    %90 = vector.load %arg2[%c0_6, %c0_7] : memref<8x2xf32, #tpu.memory_space<vmem>>, vector<8x2xf32>
    %c0_8 = arith.constant 0 : index
    %c0_9 = arith.constant 0 : index
    %91 = vector.load %arg9[%c0_8, %c0_9] : memref<5x2xf32, #tpu.memory_space<vmem>>, vector<5x2xf32>
    %c0_10 = arith.constant 0 : index
    %c0_11 = arith.constant 0 : index
    %92 = vector.load %arg10[%c0_10, %c0_11] : memref<5x2xf32, #tpu.memory_space<vmem>>, vector<5x2xf32>
    %93 = vector.extract_strided_slice %90 {offsets = [0, 0], sizes = [1, 2], strides = [1, 1]} : vector<8x2xf32> to vector<1x2xf32>
    %94 = vector.shape_cast %93 : vector<1x2xf32> to vector<1x2xf32>
    %95 = vector.broadcast %94 : vector<1x2xf32> to vector<5x2xf32>
    %96 = arith.mulf %8, %95 : vector<5x2xf32>
    %97 = arith.addf %96, %20 : vector<5x2xf32>
    %98 = arith.mulf %11, %95 : vector<5x2xf32>
    %99 = arith.addf %98, %23 : vector<5x2xf32>
    %100 = arith.mulf %14, %95 : vector<5x2xf32>
    %101 = arith.addf %100, %26 : vector<5x2xf32>
    %102 = arith.mulf %17, %95 : vector<5x2xf32>
    %103 = arith.addf %102, %29 : vector<5x2xf32>
    %104 = vector.extract_strided_slice %91 {offsets = [0, 0], sizes = [1, 2], strides = [1, 1]} : vector<5x2xf32> to vector<1x2xf32>
    %105 = vector.shape_cast %104 : vector<1x2xf32> to vector<1x2xf32>
    %106 = vector.broadcast %105 : vector<1x2xf32> to vector<5x2xf32>
    %107 = arith.mulf %32, %106 : vector<5x2xf32>
    %108 = arith.addf %97, %107 : vector<5x2xf32>
    %109 = arith.mulf %47, %106 : vector<5x2xf32>
    %110 = arith.addf %99, %109 : vector<5x2xf32>
    %111 = arith.mulf %62, %106 : vector<5x2xf32>
    %112 = arith.addf %101, %111 : vector<5x2xf32>
    %113 = arith.mulf %77, %106 : vector<5x2xf32>
    %114 = arith.addf %103, %113 : vector<5x2xf32>
    %115 = vector.extract_strided_slice %91 {offsets = [1, 0], sizes = [1, 2], strides = [1, 1]} : vector<5x2xf32> to vector<1x2xf32>
    %116 = vector.shape_cast %115 : vector<1x2xf32> to vector<1x2xf32>
    %117 = vector.broadcast %116 : vector<1x2xf32> to vector<5x2xf32>
    %118 = arith.mulf %35, %117 : vector<5x2xf32>
    %119 = arith.addf %108, %118 : vector<5x2xf32>
    %120 = arith.mulf %50, %117 : vector<5x2xf32>
    %121 = arith.addf %110, %120 : vector<5x2xf32>
    %122 = arith.mulf %65, %117 : vector<5x2xf32>
    %123 = arith.addf %112, %122 : vector<5x2xf32>
    %124 = arith.mulf %80, %117 : vector<5x2xf32>
    %125 = arith.addf %114, %124 : vector<5x2xf32>
    %126 = vector.extract_strided_slice %91 {offsets = [2, 0], sizes = [1, 2], strides = [1, 1]} : vector<5x2xf32> to vector<1x2xf32>
    %127 = vector.shape_cast %126 : vector<1x2xf32> to vector<1x2xf32>
    %128 = vector.broadcast %127 : vector<1x2xf32> to vector<5x2xf32>
    %129 = arith.mulf %38, %128 : vector<5x2xf32>
    %130 = arith.addf %119, %129 : vector<5x2xf32>
    %131 = arith.mulf %53, %128 : vector<5x2xf32>
    %132 = arith.addf %121, %131 : vector<5x2xf32>
    %133 = arith.mulf %68, %128 : vector<5x2xf32>
    %134 = arith.addf %123, %133 : vector<5x2xf32>
    %135 = arith.mulf %83, %128 : vector<5x2xf32>
    %136 = arith.addf %125, %135 : vector<5x2xf32>
    %137 = vector.extract_strided_slice %91 {offsets = [3, 0], sizes = [1, 2], strides = [1, 1]} : vector<5x2xf32> to vector<1x2xf32>
    %138 = vector.shape_cast %137 : vector<1x2xf32> to vector<1x2xf32>
    %139 = vector.broadcast %138 : vector<1x2xf32> to vector<5x2xf32>
    %140 = arith.mulf %41, %139 : vector<5x2xf32>
    %141 = arith.addf %130, %140 : vector<5x2xf32>
    %142 = arith.mulf %56, %139 : vector<5x2xf32>
    %143 = arith.addf %132, %142 : vector<5x2xf32>
    %144 = arith.mulf %71, %139 : vector<5x2xf32>
    %145 = arith.addf %134, %144 : vector<5x2xf32>
    %146 = arith.mulf %86, %139 : vector<5x2xf32>
    %147 = arith.addf %136, %146 : vector<5x2xf32>
    %148 = vector.extract_strided_slice %91 {offsets = [4, 0], sizes = [1, 2], strides = [1, 1]} : vector<5x2xf32> to vector<1x2xf32>
    %149 = vector.shape_cast %148 : vector<1x2xf32> to vector<1x2xf32>
    %150 = vector.broadcast %149 : vector<1x2xf32> to vector<5x2xf32>
    %151 = arith.mulf %44, %150 : vector<5x2xf32>
    %152 = arith.addf %141, %151 : vector<5x2xf32>
    %153 = arith.mulf %59, %150 : vector<5x2xf32>
    %154 = arith.addf %143, %153 : vector<5x2xf32>
    %155 = arith.mulf %74, %150 : vector<5x2xf32>
    %156 = arith.addf %145, %155 : vector<5x2xf32>
    %157 = arith.mulf %89, %150 : vector<5x2xf32>
    %158 = arith.addf %147, %157 : vector<5x2xf32>
    %159 = arith.negf %152 : vector<5x2xf32>
    %160 = math.exp %159 : vector<5x2xf32>
    %cst = arith.constant 1.000000e+00 : f32
    %161 = vector.broadcast %cst : f32 to vector<5x2xf32>
    %162 = arith.addf %161, %160 : vector<5x2xf32>
    %163 = arith.divf %161, %162 : vector<5x2xf32>
    %164 = arith.negf %154 : vector<5x2xf32>
    %165 = math.exp %164 : vector<5x2xf32>
    %cst_12 = arith.constant 1.000000e+00 : f32
    %166 = vector.broadcast %cst_12 : f32 to vector<5x2xf32>
    %167 = arith.addf %166, %165 : vector<5x2xf32>
    %168 = arith.divf %166, %167 : vector<5x2xf32>
    %169 = math.tanh %156 : vector<5x2xf32>
    %170 = arith.negf %158 : vector<5x2xf32>
    %171 = math.exp %170 : vector<5x2xf32>
    %cst_13 = arith.constant 1.000000e+00 : f32
    %172 = vector.broadcast %cst_13 : f32 to vector<5x2xf32>
    %173 = arith.addf %172, %171 : vector<5x2xf32>
    %174 = arith.divf %172, %173 : vector<5x2xf32>
    %175 = arith.mulf %168, %92 : vector<5x2xf32>
    %176 = arith.mulf %163, %169 : vector<5x2xf32>
    %177 = arith.addf %175, %176 : vector<5x2xf32>
    %178 = math.tanh %177 : vector<5x2xf32>
    %179 = arith.mulf %174, %178 : vector<5x2xf32>
    %180 = vector.extract_strided_slice %90 {offsets = [1, 0], sizes = [1, 2], strides = [1, 1]} : vector<8x2xf32> to vector<1x2xf32>
    %181 = vector.shape_cast %180 : vector<1x2xf32> to vector<1x2xf32>
    %182 = vector.broadcast %181 : vector<1x2xf32> to vector<5x2xf32>
    %183 = arith.mulf %8, %182 : vector<5x2xf32>
    %184 = arith.addf %183, %20 : vector<5x2xf32>
    %185 = arith.mulf %11, %182 : vector<5x2xf32>
    %186 = arith.addf %185, %23 : vector<5x2xf32>
    %187 = arith.mulf %14, %182 : vector<5x2xf32>
    %188 = arith.addf %187, %26 : vector<5x2xf32>
    %189 = arith.mulf %17, %182 : vector<5x2xf32>
    %190 = arith.addf %189, %29 : vector<5x2xf32>
    %191 = vector.extract_strided_slice %179 {offsets = [0, 0], sizes = [1, 2], strides = [1, 1]} : vector<5x2xf32> to vector<1x2xf32>
    %192 = vector.shape_cast %191 : vector<1x2xf32> to vector<1x2xf32>
    %193 = vector.broadcast %192 : vector<1x2xf32> to vector<5x2xf32>
    %194 = arith.mulf %32, %193 : vector<5x2xf32>
    %195 = arith.addf %184, %194 : vector<5x2xf32>
    %196 = arith.mulf %47, %193 : vector<5x2xf32>
    %197 = arith.addf %186, %196 : vector<5x2xf32>
    %198 = arith.mulf %62, %193 : vector<5x2xf32>
    %199 = arith.addf %188, %198 : vector<5x2xf32>
    %200 = arith.mulf %77, %193 : vector<5x2xf32>
    %201 = arith.addf %190, %200 : vector<5x2xf32>
    %202 = vector.extract_strided_slice %179 {offsets = [1, 0], sizes = [1, 2], strides = [1, 1]} : vector<5x2xf32> to vector<1x2xf32>
    %203 = vector.shape_cast %202 : vector<1x2xf32> to vector<1x2xf32>
    %204 = vector.broadcast %203 : vector<1x2xf32> to vector<5x2xf32>
    %205 = arith.mulf %35, %204 : vector<5x2xf32>
    %206 = arith.addf %195, %205 : vector<5x2xf32>
    %207 = arith.mulf %50, %204 : vector<5x2xf32>
    %208 = arith.addf %197, %207 : vector<5x2xf32>
    %209 = arith.mulf %65, %204 : vector<5x2xf32>
    %210 = arith.addf %199, %209 : vector<5x2xf32>
    %211 = arith.mulf %80, %204 : vector<5x2xf32>
    %212 = arith.addf %201, %211 : vector<5x2xf32>
    %213 = vector.extract_strided_slice %179 {offsets = [2, 0], sizes = [1, 2], strides = [1, 1]} : vector<5x2xf32> to vector<1x2xf32>
    %214 = vector.shape_cast %213 : vector<1x2xf32> to vector<1x2xf32>
    %215 = vector.broadcast %214 : vector<1x2xf32> to vector<5x2xf32>
    %216 = arith.mulf %38, %215 : vector<5x2xf32>
    %217 = arith.addf %206, %216 : vector<5x2xf32>
    %218 = arith.mulf %53, %215 : vector<5x2xf32>
    %219 = arith.addf %208, %218 : vector<5x2xf32>
    %220 = arith.mulf %68, %215 : vector<5x2xf32>
    %221 = arith.addf %210, %220 : vector<5x2xf32>
    %222 = arith.mulf %83, %215 : vector<5x2xf32>
    %223 = arith.addf %212, %222 : vector<5x2xf32>
    %224 = vector.extract_strided_slice %179 {offsets = [3, 0], sizes = [1, 2], strides = [1, 1]} : vector<5x2xf32> to vector<1x2xf32>
    %225 = vector.shape_cast %224 : vector<1x2xf32> to vector<1x2xf32>
    %226 = vector.broadcast %225 : vector<1x2xf32> to vector<5x2xf32>
    %227 = arith.mulf %41, %226 : vector<5x2xf32>
    %228 = arith.addf %217, %227 : vector<5x2xf32>
    %229 = arith.mulf %56, %226 : vector<5x2xf32>
    %230 = arith.addf %219, %229 : vector<5x2xf32>
    %231 = arith.mulf %71, %226 : vector<5x2xf32>
    %232 = arith.addf %221, %231 : vector<5x2xf32>
    %233 = arith.mulf %86, %226 : vector<5x2xf32>
    %234 = arith.addf %223, %233 : vector<5x2xf32>
    %235 = vector.extract_strided_slice %179 {offsets = [4, 0], sizes = [1, 2], strides = [1, 1]} : vector<5x2xf32> to vector<1x2xf32>
    %236 = vector.shape_cast %235 : vector<1x2xf32> to vector<1x2xf32>
    %237 = vector.broadcast %236 : vector<1x2xf32> to vector<5x2xf32>
    %238 = arith.mulf %44, %237 : vector<5x2xf32>
    %239 = arith.addf %228, %238 : vector<5x2xf32>
    %240 = arith.mulf %59, %237 : vector<5x2xf32>
    %241 = arith.addf %230, %240 : vector<5x2xf32>
    %242 = arith.mulf %74, %237 : vector<5x2xf32>
    %243 = arith.addf %232, %242 : vector<5x2xf32>
    %244 = arith.mulf %89, %237 : vector<5x2xf32>
    %245 = arith.addf %234, %244 : vector<5x2xf32>
    %246 = arith.negf %239 : vector<5x2xf32>
    %247 = math.exp %246 : vector<5x2xf32>
    %cst_14 = arith.constant 1.000000e+00 : f32
    %248 = vector.broadcast %cst_14 : f32 to vector<5x2xf32>
    %249 = arith.addf %248, %247 : vector<5x2xf32>
    %250 = arith.divf %248, %249 : vector<5x2xf32>
    %251 = arith.negf %241 : vector<5x2xf32>
    %252 = math.exp %251 : vector<5x2xf32>
    %cst_15 = arith.constant 1.000000e+00 : f32
    %253 = vector.broadcast %cst_15 : f32 to vector<5x2xf32>
    %254 = arith.addf %253, %252 : vector<5x2xf32>
    %255 = arith.divf %253, %254 : vector<5x2xf32>
    %256 = math.tanh %243 : vector<5x2xf32>
    %257 = arith.negf %245 : vector<5x2xf32>
    %258 = math.exp %257 : vector<5x2xf32>
    %cst_16 = arith.constant 1.000000e+00 : f32
    %259 = vector.broadcast %cst_16 : f32 to vector<5x2xf32>
    %260 = arith.addf %259, %258 : vector<5x2xf32>
    %261 = arith.divf %259, %260 : vector<5x2xf32>
    %262 = arith.mulf %255, %177 : vector<5x2xf32>
    %263 = arith.mulf %250, %256 : vector<5x2xf32>
    %264 = arith.addf %262, %263 : vector<5x2xf32>
    %265 = math.tanh %264 : vector<5x2xf32>
    %266 = arith.mulf %261, %265 : vector<5x2xf32>
    %267 = vector.extract_strided_slice %90 {offsets = [2, 0], sizes = [1, 2], strides = [1, 1]} : vector<8x2xf32> to vector<1x2xf32>
    %268 = vector.shape_cast %267 : vector<1x2xf32> to vector<1x2xf32>
    %269 = vector.broadcast %268 : vector<1x2xf32> to vector<5x2xf32>
    %270 = arith.mulf %8, %269 : vector<5x2xf32>
    %271 = arith.addf %270, %20 : vector<5x2xf32>
    %272 = arith.mulf %11, %269 : vector<5x2xf32>
    %273 = arith.addf %272, %23 : vector<5x2xf32>
    %274 = arith.mulf %14, %269 : vector<5x2xf32>
    %275 = arith.addf %274, %26 : vector<5x2xf32>
    %276 = arith.mulf %17, %269 : vector<5x2xf32>
    %277 = arith.addf %276, %29 : vector<5x2xf32>
    %278 = vector.extract_strided_slice %266 {offsets = [0, 0], sizes = [1, 2], strides = [1, 1]} : vector<5x2xf32> to vector<1x2xf32>
    %279 = vector.shape_cast %278 : vector<1x2xf32> to vector<1x2xf32>
    %280 = vector.broadcast %279 : vector<1x2xf32> to vector<5x2xf32>
    %281 = arith.mulf %32, %280 : vector<5x2xf32>
    %282 = arith.addf %271, %281 : vector<5x2xf32>
    %283 = arith.mulf %47, %280 : vector<5x2xf32>
    %284 = arith.addf %273, %283 : vector<5x2xf32>
    %285 = arith.mulf %62, %280 : vector<5x2xf32>
    %286 = arith.addf %275, %285 : vector<5x2xf32>
    %287 = arith.mulf %77, %280 : vector<5x2xf32>
    %288 = arith.addf %277, %287 : vector<5x2xf32>
    %289 = vector.extract_strided_slice %266 {offsets = [1, 0], sizes = [1, 2], strides = [1, 1]} : vector<5x2xf32> to vector<1x2xf32>
    %290 = vector.shape_cast %289 : vector<1x2xf32> to vector<1x2xf32>
    %291 = vector.broadcast %290 : vector<1x2xf32> to vector<5x2xf32>
    %292 = arith.mulf %35, %291 : vector<5x2xf32>
    %293 = arith.addf %282, %292 : vector<5x2xf32>
    %294 = arith.mulf %50, %291 : vector<5x2xf32>
    %295 = arith.addf %284, %294 : vector<5x2xf32>
    %296 = arith.mulf %65, %291 : vector<5x2xf32>
    %297 = arith.addf %286, %296 : vector<5x2xf32>
    %298 = arith.mulf %80, %291 : vector<5x2xf32>
    %299 = arith.addf %288, %298 : vector<5x2xf32>
    %300 = vector.extract_strided_slice %266 {offsets = [2, 0], sizes = [1, 2], strides = [1, 1]} : vector<5x2xf32> to vector<1x2xf32>
    %301 = vector.shape_cast %300 : vector<1x2xf32> to vector<1x2xf32>
    %302 = vector.broadcast %301 : vector<1x2xf32> to vector<5x2xf32>
    %303 = arith.mulf %38, %302 : vector<5x2xf32>
    %304 = arith.addf %293, %303 : vector<5x2xf32>
    %305 = arith.mulf %53, %302 : vector<5x2xf32>
    %306 = arith.addf %295, %305 : vector<5x2xf32>
    %307 = arith.mulf %68, %302 : vector<5x2xf32>
    %308 = arith.addf %297, %307 : vector<5x2xf32>
    %309 = arith.mulf %83, %302 : vector<5x2xf32>
    %310 = arith.addf %299, %309 : vector<5x2xf32>
    %311 = vector.extract_strided_slice %266 {offsets = [3, 0], sizes = [1, 2], strides = [1, 1]} : vector<5x2xf32> to vector<1x2xf32>
    %312 = vector.shape_cast %311 : vector<1x2xf32> to vector<1x2xf32>
    %313 = vector.broadcast %312 : vector<1x2xf32> to vector<5x2xf32>
    %314 = arith.mulf %41, %313 : vector<5x2xf32>
    %315 = arith.addf %304, %314 : vector<5x2xf32>
    %316 = arith.mulf %56, %313 : vector<5x2xf32>
    %317 = arith.addf %306, %316 : vector<5x2xf32>
    %318 = arith.mulf %71, %313 : vector<5x2xf32>
    %319 = arith.addf %308, %318 : vector<5x2xf32>
    %320 = arith.mulf %86, %313 : vector<5x2xf32>
    %321 = arith.addf %310, %320 : vector<5x2xf32>
    %322 = vector.extract_strided_slice %266 {offsets = [4, 0], sizes = [1, 2], strides = [1, 1]} : vector<5x2xf32> to vector<1x2xf32>
    %323 = vector.shape_cast %322 : vector<1x2xf32> to vector<1x2xf32>
    %324 = vector.broadcast %323 : vector<1x2xf32> to vector<5x2xf32>
    %325 = arith.mulf %44, %324 : vector<5x2xf32>
    %326 = arith.addf %315, %325 : vector<5x2xf32>
    %327 = arith.mulf %59, %324 : vector<5x2xf32>
    %328 = arith.addf %317, %327 : vector<5x2xf32>
    %329 = arith.mulf %74, %324 : vector<5x2xf32>
    %330 = arith.addf %319, %329 : vector<5x2xf32>
    %331 = arith.mulf %89, %324 : vector<5x2xf32>
    %332 = arith.addf %321, %331 : vector<5x2xf32>
    %333 = arith.negf %326 : vector<5x2xf32>
    %334 = math.exp %333 : vector<5x2xf32>
    %cst_17 = arith.constant 1.000000e+00 : f32
    %335 = vector.broadcast %cst_17 : f32 to vector<5x2xf32>
    %336 = arith.addf %335, %334 : vector<5x2xf32>
    %337 = arith.divf %335, %336 : vector<5x2xf32>
    %338 = arith.negf %328 : vector<5x2xf32>
    %339 = math.exp %338 : vector<5x2xf32>
    %cst_18 = arith.constant 1.000000e+00 : f32
    %340 = vector.broadcast %cst_18 : f32 to vector<5x2xf32>
    %341 = arith.addf %340, %339 : vector<5x2xf32>
    %342 = arith.divf %340, %341 : vector<5x2xf32>
    %343 = math.tanh %330 : vector<5x2xf32>
    %344 = arith.negf %332 : vector<5x2xf32>
    %345 = math.exp %344 : vector<5x2xf32>
    %cst_19 = arith.constant 1.000000e+00 : f32
    %346 = vector.broadcast %cst_19 : f32 to vector<5x2xf32>
    %347 = arith.addf %346, %345 : vector<5x2xf32>
    %348 = arith.divf %346, %347 : vector<5x2xf32>
    %349 = arith.mulf %342, %264 : vector<5x2xf32>
    %350 = arith.mulf %337, %343 : vector<5x2xf32>
    %351 = arith.addf %349, %350 : vector<5x2xf32>
    %352 = math.tanh %351 : vector<5x2xf32>
    %353 = arith.mulf %348, %352 : vector<5x2xf32>
    %354 = vector.extract_strided_slice %90 {offsets = [3, 0], sizes = [1, 2], strides = [1, 1]} : vector<8x2xf32> to vector<1x2xf32>
    %355 = vector.shape_cast %354 : vector<1x2xf32> to vector<1x2xf32>
    %356 = vector.broadcast %355 : vector<1x2xf32> to vector<5x2xf32>
    %357 = arith.mulf %8, %356 : vector<5x2xf32>
    %358 = arith.addf %357, %20 : vector<5x2xf32>
    %359 = arith.mulf %11, %356 : vector<5x2xf32>
    %360 = arith.addf %359, %23 : vector<5x2xf32>
    %361 = arith.mulf %14, %356 : vector<5x2xf32>
    %362 = arith.addf %361, %26 : vector<5x2xf32>
    %363 = arith.mulf %17, %356 : vector<5x2xf32>
    %364 = arith.addf %363, %29 : vector<5x2xf32>
    %365 = vector.extract_strided_slice %353 {offsets = [0, 0], sizes = [1, 2], strides = [1, 1]} : vector<5x2xf32> to vector<1x2xf32>
    %366 = vector.shape_cast %365 : vector<1x2xf32> to vector<1x2xf32>
    %367 = vector.broadcast %366 : vector<1x2xf32> to vector<5x2xf32>
    %368 = arith.mulf %32, %367 : vector<5x2xf32>
    %369 = arith.addf %358, %368 : vector<5x2xf32>
    %370 = arith.mulf %47, %367 : vector<5x2xf32>
    %371 = arith.addf %360, %370 : vector<5x2xf32>
    %372 = arith.mulf %62, %367 : vector<5x2xf32>
    %373 = arith.addf %362, %372 : vector<5x2xf32>
    %374 = arith.mulf %77, %367 : vector<5x2xf32>
    %375 = arith.addf %364, %374 : vector<5x2xf32>
    %376 = vector.extract_strided_slice %353 {offsets = [1, 0], sizes = [1, 2], strides = [1, 1]} : vector<5x2xf32> to vector<1x2xf32>
    %377 = vector.shape_cast %376 : vector<1x2xf32> to vector<1x2xf32>
    %378 = vector.broadcast %377 : vector<1x2xf32> to vector<5x2xf32>
    %379 = arith.mulf %35, %378 : vector<5x2xf32>
    %380 = arith.addf %369, %379 : vector<5x2xf32>
    %381 = arith.mulf %50, %378 : vector<5x2xf32>
    %382 = arith.addf %371, %381 : vector<5x2xf32>
    %383 = arith.mulf %65, %378 : vector<5x2xf32>
    %384 = arith.addf %373, %383 : vector<5x2xf32>
    %385 = arith.mulf %80, %378 : vector<5x2xf32>
    %386 = arith.addf %375, %385 : vector<5x2xf32>
    %387 = vector.extract_strided_slice %353 {offsets = [2, 0], sizes = [1, 2], strides = [1, 1]} : vector<5x2xf32> to vector<1x2xf32>
    %388 = vector.shape_cast %387 : vector<1x2xf32> to vector<1x2xf32>
    %389 = vector.broadcast %388 : vector<1x2xf32> to vector<5x2xf32>
    %390 = arith.mulf %38, %389 : vector<5x2xf32>
    %391 = arith.addf %380, %390 : vector<5x2xf32>
    %392 = arith.mulf %53, %389 : vector<5x2xf32>
    %393 = arith.addf %382, %392 : vector<5x2xf32>
    %394 = arith.mulf %68, %389 : vector<5x2xf32>
    %395 = arith.addf %384, %394 : vector<5x2xf32>
    %396 = arith.mulf %83, %389 : vector<5x2xf32>
    %397 = arith.addf %386, %396 : vector<5x2xf32>
    %398 = vector.extract_strided_slice %353 {offsets = [3, 0], sizes = [1, 2], strides = [1, 1]} : vector<5x2xf32> to vector<1x2xf32>
    %399 = vector.shape_cast %398 : vector<1x2xf32> to vector<1x2xf32>
    %400 = vector.broadcast %399 : vector<1x2xf32> to vector<5x2xf32>
    %401 = arith.mulf %41, %400 : vector<5x2xf32>
    %402 = arith.addf %391, %401 : vector<5x2xf32>
    %403 = arith.mulf %56, %400 : vector<5x2xf32>
    %404 = arith.addf %393, %403 : vector<5x2xf32>
    %405 = arith.mulf %71, %400 : vector<5x2xf32>
    %406 = arith.addf %395, %405 : vector<5x2xf32>
    %407 = arith.mulf %86, %400 : vector<5x2xf32>
    %408 = arith.addf %397, %407 : vector<5x2xf32>
    %409 = vector.extract_strided_slice %353 {offsets = [4, 0], sizes = [1, 2], strides = [1, 1]} : vector<5x2xf32> to vector<1x2xf32>
    %410 = vector.shape_cast %409 : vector<1x2xf32> to vector<1x2xf32>
    %411 = vector.broadcast %410 : vector<1x2xf32> to vector<5x2xf32>
    %412 = arith.mulf %44, %411 : vector<5x2xf32>
    %413 = arith.addf %402, %412 : vector<5x2xf32>
    %414 = arith.mulf %59, %411 : vector<5x2xf32>
    %415 = arith.addf %404, %414 : vector<5x2xf32>
    %416 = arith.mulf %74, %411 : vector<5x2xf32>
    %417 = arith.addf %406, %416 : vector<5x2xf32>
    %418 = arith.mulf %89, %411 : vector<5x2xf32>
    %419 = arith.addf %408, %418 : vector<5x2xf32>
    %420 = arith.negf %413 : vector<5x2xf32>
    %421 = math.exp %420 : vector<5x2xf32>
    %cst_20 = arith.constant 1.000000e+00 : f32
    %422 = vector.broadcast %cst_20 : f32 to vector<5x2xf32>
    %423 = arith.addf %422, %421 : vector<5x2xf32>
    %424 = arith.divf %422, %423 : vector<5x2xf32>
    %425 = arith.negf %415 : vector<5x2xf32>
    %426 = math.exp %425 : vector<5x2xf32>
    %cst_21 = arith.constant 1.000000e+00 : f32
    %427 = vector.broadcast %cst_21 : f32 to vector<5x2xf32>
    %428 = arith.addf %427, %426 : vector<5x2xf32>
    %429 = arith.divf %427, %428 : vector<5x2xf32>
    %430 = math.tanh %417 : vector<5x2xf32>
    %431 = arith.negf %419 : vector<5x2xf32>
    %432 = math.exp %431 : vector<5x2xf32>
    %cst_22 = arith.constant 1.000000e+00 : f32
    %433 = vector.broadcast %cst_22 : f32 to vector<5x2xf32>
    %434 = arith.addf %433, %432 : vector<5x2xf32>
    %435 = arith.divf %433, %434 : vector<5x2xf32>
    %436 = arith.mulf %429, %351 : vector<5x2xf32>
    %437 = arith.mulf %424, %430 : vector<5x2xf32>
    %438 = arith.addf %436, %437 : vector<5x2xf32>
    %439 = math.tanh %438 : vector<5x2xf32>
    %440 = arith.mulf %435, %439 : vector<5x2xf32>
    %441 = vector.extract_strided_slice %90 {offsets = [4, 0], sizes = [1, 2], strides = [1, 1]} : vector<8x2xf32> to vector<1x2xf32>
    %442 = vector.shape_cast %441 : vector<1x2xf32> to vector<1x2xf32>
    %443 = vector.broadcast %442 : vector<1x2xf32> to vector<5x2xf32>
    %444 = arith.mulf %8, %443 : vector<5x2xf32>
    %445 = arith.addf %444, %20 : vector<5x2xf32>
    %446 = arith.mulf %11, %443 : vector<5x2xf32>
    %447 = arith.addf %446, %23 : vector<5x2xf32>
    %448 = arith.mulf %14, %443 : vector<5x2xf32>
    %449 = arith.addf %448, %26 : vector<5x2xf32>
    %450 = arith.mulf %17, %443 : vector<5x2xf32>
    %451 = arith.addf %450, %29 : vector<5x2xf32>
    %452 = vector.extract_strided_slice %440 {offsets = [0, 0], sizes = [1, 2], strides = [1, 1]} : vector<5x2xf32> to vector<1x2xf32>
    %453 = vector.shape_cast %452 : vector<1x2xf32> to vector<1x2xf32>
    %454 = vector.broadcast %453 : vector<1x2xf32> to vector<5x2xf32>
    %455 = arith.mulf %32, %454 : vector<5x2xf32>
    %456 = arith.addf %445, %455 : vector<5x2xf32>
    %457 = arith.mulf %47, %454 : vector<5x2xf32>
    %458 = arith.addf %447, %457 : vector<5x2xf32>
    %459 = arith.mulf %62, %454 : vector<5x2xf32>
    %460 = arith.addf %449, %459 : vector<5x2xf32>
    %461 = arith.mulf %77, %454 : vector<5x2xf32>
    %462 = arith.addf %451, %461 : vector<5x2xf32>
    %463 = vector.extract_strided_slice %440 {offsets = [1, 0], sizes = [1, 2], strides = [1, 1]} : vector<5x2xf32> to vector<1x2xf32>
    %464 = vector.shape_cast %463 : vector<1x2xf32> to vector<1x2xf32>
    %465 = vector.broadcast %464 : vector<1x2xf32> to vector<5x2xf32>
    %466 = arith.mulf %35, %465 : vector<5x2xf32>
    %467 = arith.addf %456, %466 : vector<5x2xf32>
    %468 = arith.mulf %50, %465 : vector<5x2xf32>
    %469 = arith.addf %458, %468 : vector<5x2xf32>
    %470 = arith.mulf %65, %465 : vector<5x2xf32>
    %471 = arith.addf %460, %470 : vector<5x2xf32>
    %472 = arith.mulf %80, %465 : vector<5x2xf32>
    %473 = arith.addf %462, %472 : vector<5x2xf32>
    %474 = vector.extract_strided_slice %440 {offsets = [2, 0], sizes = [1, 2], strides = [1, 1]} : vector<5x2xf32> to vector<1x2xf32>
    %475 = vector.shape_cast %474 : vector<1x2xf32> to vector<1x2xf32>
    %476 = vector.broadcast %475 : vector<1x2xf32> to vector<5x2xf32>
    %477 = arith.mulf %38, %476 : vector<5x2xf32>
    %478 = arith.addf %467, %477 : vector<5x2xf32>
    %479 = arith.mulf %53, %476 : vector<5x2xf32>
    %480 = arith.addf %469, %479 : vector<5x2xf32>
    %481 = arith.mulf %68, %476 : vector<5x2xf32>
    %482 = arith.addf %471, %481 : vector<5x2xf32>
    %483 = arith.mulf %83, %476 : vector<5x2xf32>
    %484 = arith.addf %473, %483 : vector<5x2xf32>
    %485 = vector.extract_strided_slice %440 {offsets = [3, 0], sizes = [1, 2], strides = [1, 1]} : vector<5x2xf32> to vector<1x2xf32>
    %486 = vector.shape_cast %485 : vector<1x2xf32> to vector<1x2xf32>
    %487 = vector.broadcast %486 : vector<1x2xf32> to vector<5x2xf32>
    %488 = arith.mulf %41, %487 : vector<5x2xf32>
    %489 = arith.addf %478, %488 : vector<5x2xf32>
    %490 = arith.mulf %56, %487 : vector<5x2xf32>
    %491 = arith.addf %480, %490 : vector<5x2xf32>
    %492 = arith.mulf %71, %487 : vector<5x2xf32>
    %493 = arith.addf %482, %492 : vector<5x2xf32>
    %494 = arith.mulf %86, %487 : vector<5x2xf32>
    %495 = arith.addf %484, %494 : vector<5x2xf32>
    %496 = vector.extract_strided_slice %440 {offsets = [4, 0], sizes = [1, 2], strides = [1, 1]} : vector<5x2xf32> to vector<1x2xf32>
    %497 = vector.shape_cast %496 : vector<1x2xf32> to vector<1x2xf32>
    %498 = vector.broadcast %497 : vector<1x2xf32> to vector<5x2xf32>
    %499 = arith.mulf %44, %498 : vector<5x2xf32>
    %500 = arith.addf %489, %499 : vector<5x2xf32>
    %501 = arith.mulf %59, %498 : vector<5x2xf32>
    %502 = arith.addf %491, %501 : vector<5x2xf32>
    %503 = arith.mulf %74, %498 : vector<5x2xf32>
    %504 = arith.addf %493, %503 : vector<5x2xf32>
    %505 = arith.mulf %89, %498 : vector<5x2xf32>
    %506 = arith.addf %495, %505 : vector<5x2xf32>
    %507 = arith.negf %500 : vector<5x2xf32>
    %508 = math.exp %507 : vector<5x2xf32>
    %cst_23 = arith.constant 1.000000e+00 : f32
    %509 = vector.broadcast %cst_23 : f32 to vector<5x2xf32>
    %510 = arith.addf %509, %508 : vector<5x2xf32>
    %511 = arith.divf %509, %510 : vector<5x2xf32>
    %512 = arith.negf %502 : vector<5x2xf32>
    %513 = math.exp %512 : vector<5x2xf32>
    %cst_24 = arith.constant 1.000000e+00 : f32
    %514 = vector.broadcast %cst_24 : f32 to vector<5x2xf32>
    %515 = arith.addf %514, %513 : vector<5x2xf32>
    %516 = arith.divf %514, %515 : vector<5x2xf32>
    %517 = math.tanh %504 : vector<5x2xf32>
    %518 = arith.negf %506 : vector<5x2xf32>
    %519 = math.exp %518 : vector<5x2xf32>
    %cst_25 = arith.constant 1.000000e+00 : f32
    %520 = vector.broadcast %cst_25 : f32 to vector<5x2xf32>
    %521 = arith.addf %520, %519 : vector<5x2xf32>
    %522 = arith.divf %520, %521 : vector<5x2xf32>
    %523 = arith.mulf %516, %438 : vector<5x2xf32>
    %524 = arith.mulf %511, %517 : vector<5x2xf32>
    %525 = arith.addf %523, %524 : vector<5x2xf32>
    %526 = math.tanh %525 : vector<5x2xf32>
    %527 = arith.mulf %522, %526 : vector<5x2xf32>
    %528 = vector.extract_strided_slice %90 {offsets = [5, 0], sizes = [1, 2], strides = [1, 1]} : vector<8x2xf32> to vector<1x2xf32>
    %529 = vector.shape_cast %528 : vector<1x2xf32> to vector<1x2xf32>
    %530 = vector.broadcast %529 : vector<1x2xf32> to vector<5x2xf32>
    %531 = arith.mulf %8, %530 : vector<5x2xf32>
    %532 = arith.addf %531, %20 : vector<5x2xf32>
    %533 = arith.mulf %11, %530 : vector<5x2xf32>
    %534 = arith.addf %533, %23 : vector<5x2xf32>
    %535 = arith.mulf %14, %530 : vector<5x2xf32>
    %536 = arith.addf %535, %26 : vector<5x2xf32>
    %537 = arith.mulf %17, %530 : vector<5x2xf32>
    %538 = arith.addf %537, %29 : vector<5x2xf32>
    %539 = vector.extract_strided_slice %527 {offsets = [0, 0], sizes = [1, 2], strides = [1, 1]} : vector<5x2xf32> to vector<1x2xf32>
    %540 = vector.shape_cast %539 : vector<1x2xf32> to vector<1x2xf32>
    %541 = vector.broadcast %540 : vector<1x2xf32> to vector<5x2xf32>
    %542 = arith.mulf %32, %541 : vector<5x2xf32>
    %543 = arith.addf %532, %542 : vector<5x2xf32>
    %544 = arith.mulf %47, %541 : vector<5x2xf32>
    %545 = arith.addf %534, %544 : vector<5x2xf32>
    %546 = arith.mulf %62, %541 : vector<5x2xf32>
    %547 = arith.addf %536, %546 : vector<5x2xf32>
    %548 = arith.mulf %77, %541 : vector<5x2xf32>
    %549 = arith.addf %538, %548 : vector<5x2xf32>
    %550 = vector.extract_strided_slice %527 {offsets = [1, 0], sizes = [1, 2], strides = [1, 1]} : vector<5x2xf32> to vector<1x2xf32>
    %551 = vector.shape_cast %550 : vector<1x2xf32> to vector<1x2xf32>
    %552 = vector.broadcast %551 : vector<1x2xf32> to vector<5x2xf32>
    %553 = arith.mulf %35, %552 : vector<5x2xf32>
    %554 = arith.addf %543, %553 : vector<5x2xf32>
    %555 = arith.mulf %50, %552 : vector<5x2xf32>
    %556 = arith.addf %545, %555 : vector<5x2xf32>
    %557 = arith.mulf %65, %552 : vector<5x2xf32>
    %558 = arith.addf %547, %557 : vector<5x2xf32>
    %559 = arith.mulf %80, %552 : vector<5x2xf32>
    %560 = arith.addf %549, %559 : vector<5x2xf32>
    %561 = vector.extract_strided_slice %527 {offsets = [2, 0], sizes = [1, 2], strides = [1, 1]} : vector<5x2xf32> to vector<1x2xf32>
    %562 = vector.shape_cast %561 : vector<1x2xf32> to vector<1x2xf32>
    %563 = vector.broadcast %562 : vector<1x2xf32> to vector<5x2xf32>
    %564 = arith.mulf %38, %563 : vector<5x2xf32>
    %565 = arith.addf %554, %564 : vector<5x2xf32>
    %566 = arith.mulf %53, %563 : vector<5x2xf32>
    %567 = arith.addf %556, %566 : vector<5x2xf32>
    %568 = arith.mulf %68, %563 : vector<5x2xf32>
    %569 = arith.addf %558, %568 : vector<5x2xf32>
    %570 = arith.mulf %83, %563 : vector<5x2xf32>
    %571 = arith.addf %560, %570 : vector<5x2xf32>
    %572 = vector.extract_strided_slice %527 {offsets = [3, 0], sizes = [1, 2], strides = [1, 1]} : vector<5x2xf32> to vector<1x2xf32>
    %573 = vector.shape_cast %572 : vector<1x2xf32> to vector<1x2xf32>
    %574 = vector.broadcast %573 : vector<1x2xf32> to vector<5x2xf32>
    %575 = arith.mulf %41, %574 : vector<5x2xf32>
    %576 = arith.addf %565, %575 : vector<5x2xf32>
    %577 = arith.mulf %56, %574 : vector<5x2xf32>
    %578 = arith.addf %567, %577 : vector<5x2xf32>
    %579 = arith.mulf %71, %574 : vector<5x2xf32>
    %580 = arith.addf %569, %579 : vector<5x2xf32>
    %581 = arith.mulf %86, %574 : vector<5x2xf32>
    %582 = arith.addf %571, %581 : vector<5x2xf32>
    %583 = vector.extract_strided_slice %527 {offsets = [4, 0], sizes = [1, 2], strides = [1, 1]} : vector<5x2xf32> to vector<1x2xf32>
    %584 = vector.shape_cast %583 : vector<1x2xf32> to vector<1x2xf32>
    %585 = vector.broadcast %584 : vector<1x2xf32> to vector<5x2xf32>
    %586 = arith.mulf %44, %585 : vector<5x2xf32>
    %587 = arith.addf %576, %586 : vector<5x2xf32>
    %588 = arith.mulf %59, %585 : vector<5x2xf32>
    %589 = arith.addf %578, %588 : vector<5x2xf32>
    %590 = arith.mulf %74, %585 : vector<5x2xf32>
    %591 = arith.addf %580, %590 : vector<5x2xf32>
    %592 = arith.mulf %89, %585 : vector<5x2xf32>
    %593 = arith.addf %582, %592 : vector<5x2xf32>
    %594 = arith.negf %587 : vector<5x2xf32>
    %595 = math.exp %594 : vector<5x2xf32>
    %cst_26 = arith.constant 1.000000e+00 : f32
    %596 = vector.broadcast %cst_26 : f32 to vector<5x2xf32>
    %597 = arith.addf %596, %595 : vector<5x2xf32>
    %598 = arith.divf %596, %597 : vector<5x2xf32>
    %599 = arith.negf %589 : vector<5x2xf32>
    %600 = math.exp %599 : vector<5x2xf32>
    %cst_27 = arith.constant 1.000000e+00 : f32
    %601 = vector.broadcast %cst_27 : f32 to vector<5x2xf32>
    %602 = arith.addf %601, %600 : vector<5x2xf32>
    %603 = arith.divf %601, %602 : vector<5x2xf32>
    %604 = math.tanh %591 : vector<5x2xf32>
    %605 = arith.negf %593 : vector<5x2xf32>
    %606 = math.exp %605 : vector<5x2xf32>
    %cst_28 = arith.constant 1.000000e+00 : f32
    %607 = vector.broadcast %cst_28 : f32 to vector<5x2xf32>
    %608 = arith.addf %607, %606 : vector<5x2xf32>
    %609 = arith.divf %607, %608 : vector<5x2xf32>
    %610 = arith.mulf %603, %525 : vector<5x2xf32>
    %611 = arith.mulf %598, %604 : vector<5x2xf32>
    %612 = arith.addf %610, %611 : vector<5x2xf32>
    %613 = math.tanh %612 : vector<5x2xf32>
    %614 = arith.mulf %609, %613 : vector<5x2xf32>
    %615 = vector.extract_strided_slice %90 {offsets = [6, 0], sizes = [1, 2], strides = [1, 1]} : vector<8x2xf32> to vector<1x2xf32>
    %616 = vector.shape_cast %615 : vector<1x2xf32> to vector<1x2xf32>
    %617 = vector.broadcast %616 : vector<1x2xf32> to vector<5x2xf32>
    %618 = arith.mulf %8, %617 : vector<5x2xf32>
    %619 = arith.addf %618, %20 : vector<5x2xf32>
    %620 = arith.mulf %11, %617 : vector<5x2xf32>
    %621 = arith.addf %620, %23 : vector<5x2xf32>
    %622 = arith.mulf %14, %617 : vector<5x2xf32>
    %623 = arith.addf %622, %26 : vector<5x2xf32>
    %624 = arith.mulf %17, %617 : vector<5x2xf32>
    %625 = arith.addf %624, %29 : vector<5x2xf32>
    %626 = vector.extract_strided_slice %614 {offsets = [0, 0], sizes = [1, 2], strides = [1, 1]} : vector<5x2xf32> to vector<1x2xf32>
    %627 = vector.shape_cast %626 : vector<1x2xf32> to vector<1x2xf32>
    %628 = vector.broadcast %627 : vector<1x2xf32> to vector<5x2xf32>
    %629 = arith.mulf %32, %628 : vector<5x2xf32>
    %630 = arith.addf %619, %629 : vector<5x2xf32>
    %631 = arith.mulf %47, %628 : vector<5x2xf32>
    %632 = arith.addf %621, %631 : vector<5x2xf32>
    %633 = arith.mulf %62, %628 : vector<5x2xf32>
    %634 = arith.addf %623, %633 : vector<5x2xf32>
    %635 = arith.mulf %77, %628 : vector<5x2xf32>
    %636 = arith.addf %625, %635 : vector<5x2xf32>
    %637 = vector.extract_strided_slice %614 {offsets = [1, 0], sizes = [1, 2], strides = [1, 1]} : vector<5x2xf32> to vector<1x2xf32>
    %638 = vector.shape_cast %637 : vector<1x2xf32> to vector<1x2xf32>
    %639 = vector.broadcast %638 : vector<1x2xf32> to vector<5x2xf32>
    %640 = arith.mulf %35, %639 : vector<5x2xf32>
    %641 = arith.addf %630, %640 : vector<5x2xf32>
    %642 = arith.mulf %50, %639 : vector<5x2xf32>
    %643 = arith.addf %632, %642 : vector<5x2xf32>
    %644 = arith.mulf %65, %639 : vector<5x2xf32>
    %645 = arith.addf %634, %644 : vector<5x2xf32>
    %646 = arith.mulf %80, %639 : vector<5x2xf32>
    %647 = arith.addf %636, %646 : vector<5x2xf32>
    %648 = vector.extract_strided_slice %614 {offsets = [2, 0], sizes = [1, 2], strides = [1, 1]} : vector<5x2xf32> to vector<1x2xf32>
    %649 = vector.shape_cast %648 : vector<1x2xf32> to vector<1x2xf32>
    %650 = vector.broadcast %649 : vector<1x2xf32> to vector<5x2xf32>
    %651 = arith.mulf %38, %650 : vector<5x2xf32>
    %652 = arith.addf %641, %651 : vector<5x2xf32>
    %653 = arith.mulf %53, %650 : vector<5x2xf32>
    %654 = arith.addf %643, %653 : vector<5x2xf32>
    %655 = arith.mulf %68, %650 : vector<5x2xf32>
    %656 = arith.addf %645, %655 : vector<5x2xf32>
    %657 = arith.mulf %83, %650 : vector<5x2xf32>
    %658 = arith.addf %647, %657 : vector<5x2xf32>
    %659 = vector.extract_strided_slice %614 {offsets = [3, 0], sizes = [1, 2], strides = [1, 1]} : vector<5x2xf32> to vector<1x2xf32>
    %660 = vector.shape_cast %659 : vector<1x2xf32> to vector<1x2xf32>
    %661 = vector.broadcast %660 : vector<1x2xf32> to vector<5x2xf32>
    %662 = arith.mulf %41, %661 : vector<5x2xf32>
    %663 = arith.addf %652, %662 : vector<5x2xf32>
    %664 = arith.mulf %56, %661 : vector<5x2xf32>
    %665 = arith.addf %654, %664 : vector<5x2xf32>
    %666 = arith.mulf %71, %661 : vector<5x2xf32>
    %667 = arith.addf %656, %666 : vector<5x2xf32>
    %668 = arith.mulf %86, %661 : vector<5x2xf32>
    %669 = arith.addf %658, %668 : vector<5x2xf32>
    %670 = vector.extract_strided_slice %614 {offsets = [4, 0], sizes = [1, 2], strides = [1, 1]} : vector<5x2xf32> to vector<1x2xf32>
    %671 = vector.shape_cast %670 : vector<1x2xf32> to vector<1x2xf32>
    %672 = vector.broadcast %671 : vector<1x2xf32> to vector<5x2xf32>
    %673 = arith.mulf %44, %672 : vector<5x2xf32>
    %674 = arith.addf %663, %673 : vector<5x2xf32>
    %675 = arith.mulf %59, %672 : vector<5x2xf32>
    %676 = arith.addf %665, %675 : vector<5x2xf32>
    %677 = arith.mulf %74, %672 : vector<5x2xf32>
    %678 = arith.addf %667, %677 : vector<5x2xf32>
    %679 = arith.mulf %89, %672 : vector<5x2xf32>
    %680 = arith.addf %669, %679 : vector<5x2xf32>
    %681 = arith.negf %674 : vector<5x2xf32>
    %682 = math.exp %681 : vector<5x2xf32>
    %cst_29 = arith.constant 1.000000e+00 : f32
    %683 = vector.broadcast %cst_29 : f32 to vector<5x2xf32>
    %684 = arith.addf %683, %682 : vector<5x2xf32>
    %685 = arith.divf %683, %684 : vector<5x2xf32>
    %686 = arith.negf %676 : vector<5x2xf32>
    %687 = math.exp %686 : vector<5x2xf32>
    %cst_30 = arith.constant 1.000000e+00 : f32
    %688 = vector.broadcast %cst_30 : f32 to vector<5x2xf32>
    %689 = arith.addf %688, %687 : vector<5x2xf32>
    %690 = arith.divf %688, %689 : vector<5x2xf32>
    %691 = math.tanh %678 : vector<5x2xf32>
    %692 = arith.negf %680 : vector<5x2xf32>
    %693 = math.exp %692 : vector<5x2xf32>
    %cst_31 = arith.constant 1.000000e+00 : f32
    %694 = vector.broadcast %cst_31 : f32 to vector<5x2xf32>
    %695 = arith.addf %694, %693 : vector<5x2xf32>
    %696 = arith.divf %694, %695 : vector<5x2xf32>
    %697 = arith.mulf %690, %612 : vector<5x2xf32>
    %698 = arith.mulf %685, %691 : vector<5x2xf32>
    %699 = arith.addf %697, %698 : vector<5x2xf32>
    %700 = math.tanh %699 : vector<5x2xf32>
    %701 = arith.mulf %696, %700 : vector<5x2xf32>
    %702 = vector.extract_strided_slice %90 {offsets = [7, 0], sizes = [1, 2], strides = [1, 1]} : vector<8x2xf32> to vector<1x2xf32>
    %703 = vector.shape_cast %702 : vector<1x2xf32> to vector<1x2xf32>
    %704 = vector.broadcast %703 : vector<1x2xf32> to vector<5x2xf32>
    %705 = arith.mulf %8, %704 : vector<5x2xf32>
    %706 = arith.addf %705, %20 : vector<5x2xf32>
    %707 = arith.mulf %11, %704 : vector<5x2xf32>
    %708 = arith.addf %707, %23 : vector<5x2xf32>
    %709 = arith.mulf %14, %704 : vector<5x2xf32>
    %710 = arith.addf %709, %26 : vector<5x2xf32>
    %711 = arith.mulf %17, %704 : vector<5x2xf32>
    %712 = arith.addf %711, %29 : vector<5x2xf32>
    %713 = vector.extract_strided_slice %701 {offsets = [0, 0], sizes = [1, 2], strides = [1, 1]} : vector<5x2xf32> to vector<1x2xf32>
    %714 = vector.shape_cast %713 : vector<1x2xf32> to vector<1x2xf32>
    %715 = vector.broadcast %714 : vector<1x2xf32> to vector<5x2xf32>
    %716 = arith.mulf %32, %715 : vector<5x2xf32>
    %717 = arith.addf %706, %716 : vector<5x2xf32>
    %718 = arith.mulf %47, %715 : vector<5x2xf32>
    %719 = arith.addf %708, %718 : vector<5x2xf32>
    %720 = arith.mulf %62, %715 : vector<5x2xf32>
    %721 = arith.addf %710, %720 : vector<5x2xf32>
    %722 = arith.mulf %77, %715 : vector<5x2xf32>
    %723 = arith.addf %712, %722 : vector<5x2xf32>
    %724 = vector.extract_strided_slice %701 {offsets = [1, 0], sizes = [1, 2], strides = [1, 1]} : vector<5x2xf32> to vector<1x2xf32>
    %725 = vector.shape_cast %724 : vector<1x2xf32> to vector<1x2xf32>
    %726 = vector.broadcast %725 : vector<1x2xf32> to vector<5x2xf32>
    %727 = arith.mulf %35, %726 : vector<5x2xf32>
    %728 = arith.addf %717, %727 : vector<5x2xf32>
    %729 = arith.mulf %50, %726 : vector<5x2xf32>
    %730 = arith.addf %719, %729 : vector<5x2xf32>
    %731 = arith.mulf %65, %726 : vector<5x2xf32>
    %732 = arith.addf %721, %731 : vector<5x2xf32>
    %733 = arith.mulf %80, %726 : vector<5x2xf32>
    %734 = arith.addf %723, %733 : vector<5x2xf32>
    %735 = vector.extract_strided_slice %701 {offsets = [2, 0], sizes = [1, 2], strides = [1, 1]} : vector<5x2xf32> to vector<1x2xf32>
    %736 = vector.shape_cast %735 : vector<1x2xf32> to vector<1x2xf32>
    %737 = vector.broadcast %736 : vector<1x2xf32> to vector<5x2xf32>
    %738 = arith.mulf %38, %737 : vector<5x2xf32>
    %739 = arith.addf %728, %738 : vector<5x2xf32>
    %740 = arith.mulf %53, %737 : vector<5x2xf32>
    %741 = arith.addf %730, %740 : vector<5x2xf32>
    %742 = arith.mulf %68, %737 : vector<5x2xf32>
    %743 = arith.addf %732, %742 : vector<5x2xf32>
    %744 = arith.mulf %83, %737 : vector<5x2xf32>
    %745 = arith.addf %734, %744 : vector<5x2xf32>
    %746 = vector.extract_strided_slice %701 {offsets = [3, 0], sizes = [1, 2], strides = [1, 1]} : vector<5x2xf32> to vector<1x2xf32>
    %747 = vector.shape_cast %746 : vector<1x2xf32> to vector<1x2xf32>
    %748 = vector.broadcast %747 : vector<1x2xf32> to vector<5x2xf32>
    %749 = arith.mulf %41, %748 : vector<5x2xf32>
    %750 = arith.addf %739, %749 : vector<5x2xf32>
    %751 = arith.mulf %56, %748 : vector<5x2xf32>
    %752 = arith.addf %741, %751 : vector<5x2xf32>
    %753 = arith.mulf %71, %748 : vector<5x2xf32>
    %754 = arith.addf %743, %753 : vector<5x2xf32>
    %755 = arith.mulf %86, %748 : vector<5x2xf32>
    %756 = arith.addf %745, %755 : vector<5x2xf32>
    %757 = vector.extract_strided_slice %701 {offsets = [4, 0], sizes = [1, 2], strides = [1, 1]} : vector<5x2xf32> to vector<1x2xf32>
    %758 = vector.shape_cast %757 : vector<1x2xf32> to vector<1x2xf32>
    %759 = vector.broadcast %758 : vector<1x2xf32> to vector<5x2xf32>
    %760 = arith.mulf %44, %759 : vector<5x2xf32>
    %761 = arith.addf %750, %760 : vector<5x2xf32>
    %762 = arith.mulf %59, %759 : vector<5x2xf32>
    %763 = arith.addf %752, %762 : vector<5x2xf32>
    %764 = arith.mulf %74, %759 : vector<5x2xf32>
    %765 = arith.addf %754, %764 : vector<5x2xf32>
    %766 = arith.mulf %89, %759 : vector<5x2xf32>
    %767 = arith.addf %756, %766 : vector<5x2xf32>
    %768 = arith.negf %761 : vector<5x2xf32>
    %769 = math.exp %768 : vector<5x2xf32>
    %cst_32 = arith.constant 1.000000e+00 : f32
    %770 = vector.broadcast %cst_32 : f32 to vector<5x2xf32>
    %771 = arith.addf %770, %769 : vector<5x2xf32>
    %772 = arith.divf %770, %771 : vector<5x2xf32>
    %773 = arith.negf %763 : vector<5x2xf32>
    %774 = math.exp %773 : vector<5x2xf32>
    %cst_33 = arith.constant 1.000000e+00 : f32
    %775 = vector.broadcast %cst_33 : f32 to vector<5x2xf32>
    %776 = arith.addf %775, %774 : vector<5x2xf32>
    %777 = arith.divf %775, %776 : vector<5x2xf32>
    %778 = math.tanh %765 : vector<5x2xf32>
    %779 = arith.negf %767 : vector<5x2xf32>
    %780 = math.exp %779 : vector<5x2xf32>
    %cst_34 = arith.constant 1.000000e+00 : f32
    %781 = vector.broadcast %cst_34 : f32 to vector<5x2xf32>
    %782 = arith.addf %781, %780 : vector<5x2xf32>
    %783 = arith.divf %781, %782 : vector<5x2xf32>
    %784 = arith.mulf %777, %699 : vector<5x2xf32>
    %785 = arith.mulf %772, %778 : vector<5x2xf32>
    %786 = arith.addf %784, %785 : vector<5x2xf32>
    %787 = math.tanh %786 : vector<5x2xf32>
    %788 = arith.mulf %783, %787 : vector<5x2xf32>
    %c0_35 = arith.constant 0 : index
    %c0_36 = arith.constant 0 : index
    %789 = vector.load %arg9[%c0_35, %c0_36] : memref<5x2xf32, #tpu.memory_space<vmem>>, vector<5x2xf32>
    tpu.vector_store %arg9[%c0_35, %c0_36], %788 {strides = array<i32>} : memref<5x2xf32, #tpu.memory_space<vmem>>, vector<5x2xf32>,
    %c0_37 = arith.constant 0 : index
    %c0_38 = arith.constant 0 : index
    %790 = vector.load %arg10[%c0_37, %c0_38] : memref<5x2xf32, #tpu.memory_space<vmem>>, vector<5x2xf32>
    tpu.vector_store %arg10[%c0_37, %c0_38], %786 {strides = array<i32>} : memref<5x2xf32, #tpu.memory_space<vmem>>, vector<5x2xf32>,
    %c0_i32_39 = arith.constant 0 : i32
    %791 = arith.cmpi eq, %arg1, %c0_i32_39 : i32
    %792 = arith.extui %791 : i1 to i32
    %c0_i32_40 = arith.constant 0 : i32
    %793 = arith.cmpi ne, %792, %c0_i32_40 : i32
    scf.if %793 {
      %cst_41 = arith.constant 0.000000e+00 : f32
      %794 = vector.broadcast %cst_41 : f32 to vector<5x2xf32>
      %795 = arith.maximumf %788, %794 : vector<5x2xf32>
      %c0_42 = arith.constant 0 : index
      %c0_43 = arith.constant 0 : index
      %796 = vector.load %arg6[%c0_42, %c0_43] : memref<5x1xf32, #tpu.memory_space<vmem>>, vector<5x1xf32>
      %797 = vector.shape_cast %796 : vector<5x1xf32> to vector<5x1xf32>
      %798 = vector.broadcast %797 : vector<5x1xf32> to vector<5x2xf32>
      %799 = arith.mulf %795, %798 : vector<5x2xf32>
      %cst_44 = arith.constant dense<0.000000e+00> : vector<2xf32>
      %800 = vector.multi_reduction <add>, %799, %cst_44 [0] : vector<5x2xf32> to vector<2xf32>
      %801 = vector.shape_cast %800 : vector<2xf32> to vector<1x2xf32>
      %c0_45 = arith.constant 0 : index
      %c0_46 = arith.constant 0 : index
      %802 = memref.load %arg7[%c0_45, %c0_46] : memref<1x1xf32, #tpu.memory_space<smem>>
      %803 = vector.broadcast %802 : f32 to vector<1x2xf32>
      %804 = arith.addf %801, %803 : vector<1x2xf32>
      %c0_47 = arith.constant 0 : index
      %c0_48 = arith.constant 0 : index
      %805 = vector.load %arg8[%c0_47, %c0_48] : memref<1x2xf32, #tpu.memory_space<vmem>>, vector<1x2xf32>
      tpu.vector_store %arg8[%c0_47, %c0_48], %804 {strides = array<i32>} : memref<1x2xf32, #tpu.memory_space<vmem>>, vector<1x2xf32>,
    } else {
    }
    return
  }
  func.func @transform_0(%arg0: i32, %arg1: i32) -> (i32, i32) {
    %c0_i32 = arith.constant 0 : i32
    return %arg1, %arg0 : i32, i32
  }
  func.func @transform_1(%arg0: i32, %arg1: i32) -> (i32, i32) {
    %c0_i32 = arith.constant 0 : i32
    %c0_i32_0 = arith.constant 0 : i32
    %c0_i32_1 = arith.constant 0 : i32
    return %c0_i32, %c0_i32_0 : i32, i32
  }
  func.func @transform_2(%arg0: i32, %arg1: i32) -> (i32, i32) {
    %c0_i32 = arith.constant 0 : i32
    %c0_i32_0 = arith.constant 0 : i32
    %c0_i32_1 = arith.constant 0 : i32
    return %c0_i32, %c0_i32_0 : i32, i32
  }
  func.func @transform_3(%arg0: i32, %arg1: i32) -> (i32, i32) {
    %c0_i32 = arith.constant 0 : i32
    %c0_i32_0 = arith.constant 0 : i32
    %c0_i32_1 = arith.constant 0 : i32
    return %c0_i32, %c0_i32_0 : i32, i32
  }
  func.func @transform_4(%arg0: i32, %arg1: i32) -> (i32, i32) {
    %c0_i32 = arith.constant 0 : i32
    %c0_i32_0 = arith.constant 0 : i32
    %c0_i32_1 = arith.constant 0 : i32
    return %c0_i32, %c0_i32_0 : i32, i32
  }
  func.func @transform_5(%arg0: i32, %arg1: i32) -> (i32, i32) {
    %c0_i32 = arith.constant 0 : i32
    %c0_i32_0 = arith.constant 0 : i32
    %c0_i32_1 = arith.constant 0 : i32
    return %c0_i32, %c0_i32_0 : i32, i32
  }
  func.func @transform_6(%arg0: i32, %arg1: i32) -> (i32, i32) {
    %c0_i32 = arith.constant 0 : i32
    %c0_i32_0 = arith.constant 0 : i32
    return %c0_i32, %arg0 : i32, i32
  }
}

</mosaic_0001>

<bundles_post_ra>
// kernel: tpu_custom_call.1
= control target key start
LH: loop header
LB: loop body
LE: loop exit
PB: predicated region body
PF: predicated region fallthrough
CT: control target
= control target key end

     0   :  { %v1188_v2 = vmov 0   ;;  %v153_v3 = vlaneseq  ;;  %s1812_s0 = inlined_call_operand.vmem [shape: f32[8,2], index: 0, kind: input, shape index: {}]   ;;  %s1813_s1 = inlined_call_operand.vmem [shape: f32[5,4], index: 1, kind: input, shape index: {}]   ;;  %s1814_s2 = inlined_call_operand.vmem [shape: f32[5,20], index: 2, kind: input, shape index: {}]   ;;  %s1815_s3 = inlined_call_operand.vmem [shape: f32[5,4], index: 3, kind: input, shape index: {}]   ;;  %s1816_s4 = inlined_call_operand.vmem [shape: f32[5,1], index: 4, kind: input, shape index: {}]   ;;  %s1817_s5 = inlined_call_operand.<no memory space> [shape: f32[1,1], index: 5, kind: input, shape index: {}]   ;;  %s1818_s6 = inlined_call_operand.hbm [shape: f32[1,2], index: 6, kind: output, shape index: {}]  }
   0x1   :  { %v1248_v0 = vld [vmem:[%s1815_s3] sm:$0x1f]  ;;  %1009 = vset.pattern.permute.xlu1 %v1188_v2  ;;  %1007 = vset.pattern.permute.xlu0 %v1188_v2 }
   0x2   :  { %v1253_v1 = vld [vmem:[%s1813_s1] sm:$0x1f]  ;;  %54 = vperm.xlu1 %1009, %v1248_v0  }
   0x3   :  { %37 = vperm.xlu0 %1007, %v1253_v1  }
   0x4   :  { %12 = vsyncpa [#allocation6], 0  ;;  %v1259_v4 = vshrl.u32 %v153_v3, 7  ;;  %vm29_vm0 = vcmask 12288   ;;  %v1189_v5 = vmov 1   ;;  %v1266_v6 = vld [vmem:[%s1812_s0] sm:$0xff] }
   0x5   :  { %v1190_v7 = vmov 0.0   ;;  %v1276_v11 = vld [vmem:[%s1814_s2] sm:$0x1f]  ;;  %v1191_v15 = vmov 5   ;;  %v1192_v16 = vmov 8   ;;  %v1193_v17 = vmov 6  }
   0x6   :  { %1010 = vset.pattern.permute.xlu1 %v1189_v5  ;;  %30 = vst.msk [vmem:[#allocation2] sm:$0x1f] %vm29_vm0, %v1190_v7  ;;  %31 = vst.msk [vmem:[#allocation3] sm:$0x1f] %vm29_vm0, %v1190_v7  ;;  %v635_v8 = vsub.s32 5, %v1259_v4  ;;  %v731_v9 = vsub.s32 6, %v1259_v4 }
   0x7   :  { %1008 = vset.pattern.permute.xlu0 %v1189_v5  ;;  %58 = vperm.xlu1 %1010, %v1248_v0   ;;  %v827_v10 = vsub.s32 7, %v1259_v4  ;;  %v1194_v18 = vmov 2   ;;  %v1195_v19 = vmov 7   ;;  %v1196_v20 = vmov 3   ;;  %v928_v33 = vld [vmem:[%s1816_s4] sm:$0x1f] }
   0x8   :  { %41 = vperm.xlu0 %1008, %v1253_v1   ;;  %v1279_v12 = vrot.slane %v1266_v6, %v635_v8  ;;  %v1282_v13 = vrot.slane %v1266_v6, %v731_v9  ;;  %v1197_v21 = vmov 11   ;;  %v1198_v22 = vmov 4   ;;  %s1209_s28 = smov [#allocation5]  }
   0x9   :  { %v1285_v14 = vrot.slane %v1266_v6, %v827_v10  ;;  %v1199_v23 = vmov 17   ;;  %v1200_v24 = vmov 9   ;;  %v1201_v25 = vmov 14   ;;  %s953_s29 = sshll.u32 %s1209_s28, 4  ;;  %s954_s29 = int_to_ptr.vmem [resolvable:$true] %s953_s29 }
   0xa   :  { %v1202_v26 = vmov 10   ;;  %v1203_v27 = vmov 15   ;;  %v1204_v28 = vmov 16   ;;  %v1205_v29 = vmov 12   ;;  %s1164_s30 = scalar_lea.vmem %s954_s29, 16  ;;  %s1168_s7 = scalar_lea.vmem %s954_s29, 32 }
   0xb   :  { %1011 = vset.pattern.permute.xlu1 %v1188_v2  ;;  %v1206_v30 = vmov 13   ;;  %v1207_v31 = vmov 18   ;;  %v1208_v32 = vmov 19   ;;  %v1318_v34 = vsub.s32 1, %v1259_v4  ;;  %p1165_p0 = scmp.ne.s32.totalorder %s954_s29, %s1164_s30  ;;  %p1169_p1 = scmp.lt.s32.totalorder %s954_s29, %s954_s29 }
   0xc   :  { %1012 = vset.pattern.permute.xlu0 %v1191_v15  ;;  %71 = vperm.xlu1 %1011, %v1276_v11   ;;  %v1321_v35 = vsub.s32 2, %v1259_v4  ;;  %v1324_v36 = vsub.s32 3, %v1259_v4  ;;  %v1327_v37 = vsub.s32 4, %v1259_v4  ;;  %vm945_vm1 = vcmask 8192   ;;  %p1170_p2 = scmp.lt.s32.totalorder %s1168_s7, %s1164_s30 }
   0xd   :  { %91 = vperm.xlu0 %1012, %v1276_v11   ;;  %v1331_v38 = vrot.slane %v1266_v6, %v1318_v34 }
   0xe   :  { %v1335_v39 = vrot.slane %v1266_v6, %v1321_v35  ;;  %v1339_v40 = vrot.slane %v1266_v6, %v1324_v36  ;;  %v1343_v41 = vrot.slane %v1266_v6, %v1327_v37  ;;  %p1171_p3 = por %p1170_p2, %p1169_p1 }
  0x10   :  { %1013 = vset.pattern.permute.xlu1 %v1189_v5  ;;  %p1172_p4 = pnand %p1171_p3, %p1165_p0 }
  0x11   :  { %1017 = vset.pattern.permute.xlu0 %v1192_v16  ;;  %75 = vperm.xlu1 %1013, %v1276_v11  }
  0x12   :  { %103 = vperm.xlu0 %1017, %v1276_v11  }
  0x15   :  { %1014 = vset.pattern.permute.xlu1 %v1193_v17 }
  0x16   :  { %1018 = vset.pattern.permute.xlu0 %v1194_v18  ;;  %95 = vperm.xlu1 %1014, %v1276_v11  }
  0x17   :  { %79 = vperm.xlu0 %1018, %v1276_v11  }
  0x1a   :  { %1015 = vset.pattern.permute.xlu1 %v1195_v19 }
  0x1b   :  { %45 = vperm.xlu0 %1018, %v1253_v1   ;;  %99 = vperm.xlu1 %1015, %v1276_v11  }
  0x1f   :  { %1023 = vset.pattern.permute.xlu0 %v1196_v20  ;;  %1016 = vset.pattern.permute.xlu1 %v1196_v20 }
  0x20   :  { %66 = vperm.xlu0 %1023, %v1248_v0   ;;  %83 = vperm.xlu1 %1016, %v1276_v11  }
  0x24   :  { %1026 = vset.pattern.permute.xlu0 %v1197_v21  ;;  %1019 = vset.pattern.permute.xlu1 %v1198_v22 }
  0x25   :  { %115 = vperm.xlu0 %1026, %v1276_v11   ;;  %87 = vperm.xlu1 %1019, %v1276_v11  }
  0x29   :  { %1029 = vset.pattern.permute.xlu0 %v1199_v23  ;;  %1020 = vset.pattern.permute.xlu1 %v1200_v24 }
  0x2a   :  { %139 = vperm.xlu0 %1029, %v1276_v11   ;;  %107 = vperm.xlu1 %1020, %v1276_v11  }
  0x2e   :  { %1032 = vset.pattern.permute.xlu0 %v1201_v25  ;;  %1021 = vset.pattern.permute.xlu1 %v1196_v20 }
  0x2f   :  { %127 = vperm.xlu0 %1032, %v1276_v11   ;;  %49 = vperm.xlu1 %1021, %v1253_v1  }
  0x33   :  { %1035 = vset.pattern.permute.xlu0 %v1188_v2  ;;  %1022 = vset.pattern.permute.xlu1 %v1194_v18 }
  0x34   :  { %62 = vperm.xlu1 %1022, %v1248_v0  }
  0x38   :  { %1024 = vset.pattern.permute.xlu1 %v1202_v26 }
  0x39   :  { %111 = vperm.xlu1 %1024, %v1276_v11  }
  0x3d   :  { %1025 = vset.pattern.permute.xlu1 %v1203_v27 }
  0x3e   :  { %131 = vperm.xlu1 %1025, %v1276_v11  }
  0x42   :  { %1027 = vset.pattern.permute.xlu1 %v1204_v28 }
  0x43   :  { %135 = vperm.xlu1 %1027, %v1276_v11  }
  0x47   :  { %1028 = vset.pattern.permute.xlu1 %v1205_v29 }
  0x48   :  { %119 = vperm.xlu1 %1028, %v1276_v11  }
  0x4c   :  { %1030 = vset.pattern.permute.xlu1 %v1206_v30  ;;  %v1418_v30 = vsub.s32 0, %v1259_v4 }
  0x4d   :  { %123 = vperm.xlu1 %1030, %v1276_v11  }
  0x51   :  { %1031 = vset.pattern.permute.xlu1 %v1207_v31 }
  0x52   :  { %143 = vperm.xlu1 %1031, %v1276_v11  }
  0x56   :  { %1033 = vset.pattern.permute.xlu1 %v1208_v32  ;;  %v1424_v32 = vrot.slane %v1266_v6, %v1418_v30 }
  0x57   :  { %147 = vperm.xlu1 %1033, %v1276_v11  }
  0x5b   :  { %1034 = vset.pattern.permute.xlu1 %v1188_v2 }
  0x5c   :  { %931 = vperm.xlu1 %1034, %v928_v33   ;;  %v151_v33 = vld [vmem:[#allocation2] sm:$0x1f] }
  0x81   :  { %v55_v42 = vpop.permute.xlu1 %54 }
  0x82   :  { %v38_v43 = vpop.permute.xlu0 %37 }
  0x83   :  { %v253_v44 = vmul.f32 %v1331_v38, %v38_v43  ;;  %v349_v45 = vmul.f32 %v1335_v39, %v38_v43  ;;  %v445_v46 = vmul.f32 %v1339_v40, %v38_v43  ;;  %v541_v47 = vmul.f32 %v1343_v41, %v38_v43 }
  0x84   :  { %v637_v48 = vmul.f32 %v1279_v12, %v38_v43  ;;  %v733_v49 = vmul.f32 %v1282_v13, %v38_v43  ;;  %v829_v50 = vmul.f32 %v1285_v14, %v38_v43 }
  0x85   :  { %v1352_v51 = vadd.f32 %v253_v44, %v55_v42  ;;  %v1354_v52 = vadd.f32 %v349_v45, %v55_v42  ;;  %v1356_v53 = vadd.f32 %v445_v46, %v55_v42  ;;  %v1358_v54 = vadd.f32 %v541_v47, %v55_v42 }
  0x86   :  { %v1360_v55 = vadd.f32 %v637_v48, %v55_v42  ;;  %v1362_v56 = vadd.f32 %v733_v49, %v55_v42  ;;  %v1364_v57 = vadd.f32 %v829_v50, %v55_v42  ;;  %v59_v58 = vpop.permute.xlu1 %58  ;;  %v1429_v45 = vrot.slane %v151_v33, %v1418_v30 }
  0x87   :  { %v42_v59 = vpop.permute.xlu0 %41  ;;  %v157_v46 = vmul.f32 %v1424_v32, %v38_v43  ;;  %v1436_v48 = vrot.slane %v151_v33, %v1318_v34 }
  0x88   :  { %1819 = vst [vmem:[#allocation8_spill] sm:$0xff] %v1360_v55  ;;  %1820 = vst [vmem:[#allocation9_spill] sm:$0xff] %v1362_v56  ;;  %v255_v60 = vmul.f32 %v1331_v38, %v42_v59  ;;  %v351_v61 = vmul.f32 %v1335_v39, %v42_v59  ;;  %v447_v62 = vmul.f32 %v1339_v40, %v42_v59 }
  0x89   :  { %1821 = vst [vmem:[#allocation10_spill] sm:$0xff] %v1364_v57  ;;  %v543_v63 = vmul.f32 %v1343_v41, %v42_v59  ;;  %v639_v0 = vmul.f32 %v1279_v12, %v42_v59  ;;  %v735_v1 = vmul.f32 %v1282_v13, %v42_v59  ;;  %v831_v2 = vmul.f32 %v1285_v14, %v42_v59 }
  0x8a   :  { %v1373_v3 = vadd.f32 %v255_v60, %v59_v58  ;;  %v1375_v5 = vadd.f32 %v351_v61, %v59_v58  ;;  %v1377_v7 = vadd.f32 %v447_v62, %v59_v58  ;;  %v159_v47 = vmul.f32 %v1424_v32, %v42_v59 }
  0x8b   :  { %v1379_v8 = vadd.f32 %v543_v63, %v59_v58  ;;  %v1381_v9 = vadd.f32 %v639_v0, %v59_v58  ;;  %v1383_v10 = vadd.f32 %v735_v1, %v59_v58  ;;  %v1385_v11 = vadd.f32 %v831_v2, %v59_v58  ;;  %v1387_v15 = vpop.permute.xlu1 %71 }
  0x8c   :  { %v1389_v16 = vpop.permute.xlu0 %91  ;;  %v158_v49 = vadd.f32 %v157_v46, %v55_v42  ;;  %v160_v50 = vadd.f32 %v159_v47, %v59_v58  ;;  %v1443_v61 = vrot.slane %v151_v33, %v1321_v35  ;;  %v169_v62 = vmul.f32 %v1429_v45, %v1387_v15 }
  0x8d   :  { %1822 = vst [vmem:[#allocation11_spill] sm:$0xff] %v1381_v9  ;;  %1823 = vst [vmem:[#allocation12_spill] sm:$0xff] %v1383_v10  ;;  %v171_v4 = vmul.f32 %v1429_v45, %v1389_v16 }
  0x8e   :  { %1824 = vst [vmem:[#allocation13_spill] sm:$0xff] %v1385_v11 }
  0x8f   :  { %v172_v2 = vadd.f32 %v171_v4, %v160_v50  ;;  %v204_v50 = vrot.slane %v151_v33, %v1324_v36 }
  0x90   :  { %v1391_v17 = vpop.permute.xlu1 %75 }
  0x91   :  { %v1393_v18 = vpop.permute.xlu0 %103  ;;  %v181_v46 = vmul.f32 %v1436_v48, %v1391_v17 }
  0x95   :  { %v1395_v19 = vpop.permute.xlu1 %95 }
  0x96   :  { %v1397_v20 = vpop.permute.xlu0 %79  ;;  %v183_v42 = vmul.f32 %v1436_v48, %v1395_v19 }
  0x9a   :  { %v1399_v21 = vpop.permute.xlu0 %45  ;;  %v1401_v22 = vpop.permute.xlu1 %99 }
  0x9b   :  { %v353_v23 = vmul.f32 %v1335_v39, %v1399_v21  ;;  %v449_v24 = vmul.f32 %v1339_v40, %v1399_v21  ;;  %v545_v25 = vmul.f32 %v1343_v41, %v1399_v21  ;;  %v641_v26 = vmul.f32 %v1279_v12, %v1399_v21 }
  0x9c   :  { %v737_v27 = vmul.f32 %v1282_v13, %v1399_v21  ;;  %v833_v28 = vmul.f32 %v1285_v14, %v1399_v21  ;;  %v195_v4 = vmul.f32 %v1443_v61, %v1401_v22 }
  0x9f   :  { %v1415_v29 = vpop.permute.xlu1 %83  ;;  %v1440_v60 = vpop.permute.xlu0 %66 }
  0xa4   :  { %v1420_v31 = vpop.permute.xlu1 %87 }
  0xa9   :  { %v1426_v44 = vpop.permute.xlu1 %107 }
  0xae   :  { %v1438_v6 = vpop.permute.xlu1 %49 }
  0xaf   :  { %v355_v43 = vmul.f32 %v1335_v39, %v1438_v6  ;;  %v451_v59 = vmul.f32 %v1339_v40, %v1438_v6  ;;  %v547_v58 = vmul.f32 %v1343_v41, %v1438_v6  ;;  %v643_v63 = vmul.f32 %v1279_v12, %v1438_v6 }
  0xb0   :  { %v739_v0 = vmul.f32 %v1282_v13, %v1438_v6  ;;  %v835_v39 = vmul.f32 %v1285_v14, %v1438_v6 }
  0xb1   :  { %v1462_v40 = vadd.f32 %v355_v43, %v1440_v60  ;;  %v1465_v1 = vadd.f32 %v451_v59, %v1440_v60  ;;  %v1470_v41 = vadd.f32 %v547_v58, %v1440_v60  ;;  %v1473_v12 = vadd.f32 %v643_v63, %v1440_v60 }
  0xb2   :  { %v1476_v13 = vadd.f32 %v739_v0, %v1440_v60  ;;  %v1479_v14 = vadd.f32 %v835_v39, %v1440_v60  ;;  %v170_v43 = vadd.f32 %v169_v62, %v158_v49  ;;  %v1487_v59 = vrot.slane %v151_v33, %v1327_v37 }
  0xb3   :  { %1825 = vst [vmem:[#allocation14_spill] sm:$0xff] %v1470_v41  ;;  %1826 = vst [vmem:[#allocation15_spill] sm:$0xff] %v1473_v12  ;;  %v1481_v47 = vpop.permute.xlu1 %62  ;;  %v184_v0 = vadd.f32 %v183_v42, %v172_v2  ;;  %v193_v39 = vmul.f32 %v1443_v61, %v1397_v20  ;;  %v207_v42 = vmul.f32 %v204_v50, %v1393_v18 }
  0xb4   :  { %1827 = vst [vmem:[#allocation16_spill] sm:$0xff] %v1476_v13  ;;  %1828 = vst [vmem:[#allocation17_spill] sm:$0xff] %v1479_v14  ;;  %v1490_v58 = vadd.f32 %v353_v23, %v1481_v47  ;;  %v1493_v63 = vadd.f32 %v449_v24, %v1481_v47  ;;  %v1498_v49 = vadd.f32 %v545_v25, %v1481_v47 }
  0xb5   :  { %v1501_v62 = vadd.f32 %v641_v26, %v1481_v47  ;;  %v1504_v14 = vadd.f32 %v737_v27, %v1481_v47  ;;  %v1507_v33 = vadd.f32 %v833_v28, %v1481_v47  ;;  %v182_v23 = vadd.f32 %v181_v46, %v170_v43 }
  0xb6   :  { %v205_v24 = vmul.f32 %v204_v50, %v1415_v29  ;;  %v196_v11 = vadd.f32 %v195_v4, %v184_v0  ;;  %v217_v25 = vmul.f32 %v1487_v59, %v1420_v31  ;;  %v219_v26 = vmul.f32 %v1487_v59, %v1426_v44  ;;  %v1521_v0 = vpop.permute.xlu0 %115 }
  0xb7   :  { %1829 = vst [vmem:[#allocation18_spill] sm:$0xff] %v1501_v62  ;;  %1830 = vst [vmem:[#allocation19_spill] sm:$0xff] %v1504_v14  ;;  %v194_v57 = vadd.f32 %v193_v39, %v182_v23  ;;  %v161_v4 = vmul.f32 %v1424_v32, %v1399_v21 }
  0xb8   :  { %1831 = vst [vmem:[#allocation20_spill] sm:$0xff] %v1507_v33  ;;  %v1511_v2 = vpop.permute.xlu1 %111  ;;  %v208_v13 = vadd.f32 %v207_v42, %v196_v11  ;;  %v163_v42 = vmul.f32 %v1424_v32, %v1438_v6 }
  0xb9   :  { %v206_v27 = vadd.f32 %v205_v24, %v194_v57  ;;  %v173_v23 = vmul.f32 %v1429_v45, %v1511_v2  ;;  %v162_v57 = vadd.f32 %v161_v4, %v1481_v47 }
  0xba   :  { %v220_v46 = vadd.f32 %v219_v26, %v208_v13  ;;  %v1528_v11 = vpop.permute.xlu0 %139  ;;  %v164_v4 = vadd.f32 %v163_v42, %v1440_v60 }
  0xbb   :  { %v218_v14 = vadd.f32 %v217_v25, %v206_v27  ;;  %v174_v13 = vadd.f32 %v173_v23, %v162_v57 }
  0xbc   :  { %v962_v33 = vmul.f32 -1.442695, %v220_v46 }
  0xbd   :  { %v1517_v28 = vpop.permute.xlu1 %131  ;;  %v961_v43 = vmul.f32 -1.442695, %v218_v14  ;;  %v185_v14 = vmul.f32 %v1436_v48, %v1521_v0 }
  0xbe   :  { %v1536_v25 = vpop.permute.xlu0 %127  ;;  %v175_v27 = vmul.f32 %v1429_v45, %v1517_v28 }
  0xbf   :  { %1036 = vpow2.f32 %v961_v43  ;;  %v186_v46 = vadd.f32 %v185_v14, %v174_v13  ;;  %v199_v13 = vmul.f32 %v1443_v61, %v1528_v11 }
  0xc0   :  { %1038 = vpow2.f32 %v962_v33  ;;  %v221_v33 = vmul.f32 %v1487_v59, %v1536_v25  ;;  %v176_v12 = vadd.f32 %v175_v27, %v164_v4 }
  0xc2   :  { %v1523_v39 = vpop.permute.xlu1 %135 }
  0xc3   :  { %v187_v23 = vmul.f32 %v1436_v48, %v1523_v39 }
  0xc5   :  { %v188_v45 = vadd.f32 %v187_v23, %v176_v12 }
  0xc7   :  { %v1530_v24 = vpop.permute.xlu1 %119  ;;  %v200_v48 = vadd.f32 %v199_v13, %v188_v45 }
  0xc8   :  { %v197_v26 = vmul.f32 %v1443_v61, %v1530_v24 }
  0xc9   :  { %v1037_v10 = vpop.eup %1036 }
  0xca   :  { %v198_v32 = vadd.f32 %v197_v26, %v186_v46  ;;  %v1039_v56 = vpop.eup %1038  ;;  %v228_v55 = vadd.f32 1.0, %v1037_v10  ;;  %v152_v10 = vld [vmem:[#allocation3] sm:$0x1f] }
  0xcb   :  { %v234_v41 = vadd.f32 1.0, %v1039_v56 }
  0xcc   :  { %v1542_v43 = vpop.permute.xlu1 %123 }
  0xcd   :  { %v209_v57 = vmul.f32 %v204_v50, %v1542_v43 }
  0xcf   :  { %v210_v62 = vadd.f32 %v209_v57, %v198_v32 }
  0xd1   :  { %v1550_v9 = vpop.permute.xlu1 %143  ;;  %v222_v14 = vadd.f32 %v221_v33, %v210_v62 }
  0xd2   :  { %v211_v42 = vmul.f32 %v204_v50, %v1550_v9 }
  0xd3   :  { %1040 = vtanh.f32 %v222_v14 }
  0xd4   :  { %1042 = vrcp.f32 %v228_v55  ;;  %v212_v46 = vadd.f32 %v211_v42, %v200_v48  ;;  %v257_v42 = vmul.f32 %v1331_v38, %v1399_v21 }
  0xd5   :  { %1044 = vrcp.f32 %v234_v41 }
  0xd6   :  { %v1555_v26 = vpop.permute.xlu1 %147 }
  0xd7   :  { %v223_v27 = vmul.f32 %v1487_v59, %v1555_v26  ;;  %v259_v59 = vmul.f32 %v1331_v38, %v1438_v6 }
  0xd9   :  { %v224_v4 = vadd.f32 %v223_v27, %v212_v46  ;;  %v260_v48 = vadd.f32 %v259_v59, %v1440_v60 }
  0xdb   :  { %v963_v12 = vmul.f32 -1.442695, %v224_v4 }
  0xdd   :  { %1046 = vpow2.f32 %v963_v12  ;;  %v1041_v23 = vpop.eup %1040 }
  0xde   :  { %v1043_v61 = vpop.eup %1042 }
  0xdf   :  { %v1045_v62 = vpop.eup %1044  ;;  %v245_v56 = vmul.f32 %v1043_v61, %v1041_v23 }
  0xe0   :  { %v244_v33 = vmul.f32 %v1045_v62, %v152_v10  ;;  %v258_v10 = vadd.f32 %v257_v42, %v1481_v47 }
  0xe2   :  { %v1559_v50 = vadd.f32 %v245_v56, %v244_v33 }
  0xe4   :  { %1048 = vtanh.f32 %v1559_v50 }
  0xe7   :  { %v1047_v32 = vpop.eup %1046 }
  0xe8   :  { %v241_v55 = vadd.f32 1.0, %v1047_v32 }
  0xea   :  { %1050 = vrcp.f32 %v241_v55 }
  0xee   :  { %v1049_v41 = vpop.eup %1048 }
  0xf4   :  { %v1051_v57 = vpop.eup %1050 }
  0xf5   :  { %v248_v45 = vmul.f32 %v1051_v57, %v1049_v41 }
  0xf7   :  { %v264_v13 = vrot.slane %v248_v45, %v1418_v30  ;;  %v276_v14 = vrot.slane %v248_v45, %v1318_v34  ;;  %v288_v12 = vrot.slane %v248_v45, %v1321_v35  ;;  %v300_v61 = vrot.slane %v248_v45, %v1324_v36 }
  0xf8   :  { %v312_v33 = vrot.slane %v248_v45, %v1327_v37 }
  0xf9   :  { %v265_v46 = vmul.f32 %v264_v13, %v1387_v15  ;;  %v267_v27 = vmul.f32 %v264_v13, %v1389_v16  ;;  %v271_v4 = vmul.f32 %v264_v13, %v1517_v28  ;;  %v269_v6 = vmul.f32 %v264_v13, %v1511_v2 }
  0xfa   :  { %v277_v23 = vmul.f32 %v276_v14, %v1391_v17  ;;  %v279_v60 = vmul.f32 %v276_v14, %v1395_v19  ;;  %v283_v56 = vmul.f32 %v276_v14, %v1523_v39  ;;  %v289_v41 = vmul.f32 %v288_v12, %v1397_v20 }
  0xfb   :  { %v266_v62 = vadd.f32 %v265_v46, %v1352_v51  ;;  %v268_v38 = vadd.f32 %v267_v27, %v1373_v3  ;;  %v272_v21 = vadd.f32 %v271_v4, %v260_v48  ;;  %v291_v57 = vmul.f32 %v288_v12, %v1401_v22 }
  0xfc   :  { %v270_v59 = vadd.f32 %v269_v6, %v258_v10  ;;  %v301_v3 = vmul.f32 %v300_v61, %v1415_v29  ;;  %v303_v48 = vmul.f32 %v300_v61, %v1393_v18  ;;  %v281_v47 = vmul.f32 %v276_v14, %v1521_v0 }
  0xfd   :  { %v278_v32 = vadd.f32 %v277_v23, %v266_v62  ;;  %v280_v55 = vadd.f32 %v279_v60, %v268_v38  ;;  %v284_v13 = vadd.f32 %v283_v56, %v272_v21  ;;  %v295_v42 = vmul.f32 %v288_v12, %v1528_v11 }
  0xfe   :  { %v313_v4 = vmul.f32 %v312_v33, %v1420_v31  ;;  %v315_v23 = vmul.f32 %v312_v33, %v1426_v44  ;;  %v282_v38 = vadd.f32 %v281_v47, %v270_v59  ;;  %v307_v60 = vmul.f32 %v300_v61, %v1550_v9 }
  0xff   :  { %v290_v51 = vadd.f32 %v289_v41, %v278_v32  ;;  %v292_v46 = vadd.f32 %v291_v57, %v280_v55  ;;  %v296_v62 = vadd.f32 %v295_v42, %v284_v13  ;;  %v293_v10 = vmul.f32 %v288_v12, %v1530_v24 }
 0x100   :  { %v319_v41 = vmul.f32 %v312_v33, %v1555_v26  ;;  %v305_v57 = vmul.f32 %v300_v61, %v1542_v43  ;;  %v317_v59 = vmul.f32 %v312_v33, %v1536_v25 }
 0x101   :  { %v302_v27 = vadd.f32 %v301_v3, %v290_v51  ;;  %v304_v45 = vadd.f32 %v303_v48, %v292_v46  ;;  %v308_v55 = vadd.f32 %v307_v60, %v296_v62  ;;  %v294_v14 = vadd.f32 %v293_v10, %v282_v38 }
 0x103   :  { %v314_v6 = vadd.f32 %v313_v4, %v302_v27  ;;  %v316_v21 = vadd.f32 %v315_v23, %v304_v45  ;;  %v320_v51 = vadd.f32 %v319_v41, %v308_v55  ;;  %v306_v46 = vadd.f32 %v305_v57, %v294_v14 }
 0x105   :  { %v964_v56 = vmul.f32 -1.442695, %v314_v6  ;;  %v965_v32 = vmul.f32 -1.442695, %v316_v21  ;;  %v966_v13 = vmul.f32 -1.442695, %v320_v51  ;;  %v318_v3 = vadd.f32 %v317_v59, %v306_v46 }
 0x107   :  { %1052 = vpow2.f32 %v964_v56 }
 0x108   :  { %1054 = vpow2.f32 %v965_v32 }
 0x109   :  { %1056 = vpow2.f32 %v966_v13 }
 0x10a   :  { %1058 = vtanh.f32 %v318_v3 }
 0x111   :  { %v1053_v48 = vpop.eup %1052 }
 0x112   :  { %v1055_v47 = vpop.eup %1054  ;;  %v324_v42 = vadd.f32 1.0, %v1053_v48 }
 0x113   :  { %v330_v12 = vadd.f32 1.0, %v1055_v47  ;;  %v1057_v27 = vpop.eup %1056 }
 0x114   :  { %1060 = vrcp.f32 %v324_v42  ;;  %v1059_v45 = vpop.eup %1058  ;;  %v337_v62 = vadd.f32 1.0, %v1057_v27 }
 0x115   :  { %1062 = vrcp.f32 %v330_v12 }
 0x116   :  { %1064 = vrcp.f32 %v337_v62 }
 0x11e   :  { %v1061_v4 = vpop.eup %1060 }
 0x11f   :  { %v1063_v23 = vpop.eup %1062  ;;  %v341_v61 = vmul.f32 %v1061_v4, %v1059_v45 }
 0x120   :  { %v340_v38 = vmul.f32 %v1063_v23, %v1559_v50  ;;  %v1065_v33 = vpop.eup %1064 }
 0x122   :  { %v1596_v6 = vadd.f32 %v341_v61, %v340_v38 }
 0x124   :  { %1066 = vtanh.f32 %v1596_v6 }
 0x12e   :  { %v1067_v21 = vpop.eup %1066 }
 0x12f   :  { %v344_v60 = vmul.f32 %v1067_v21, %v1065_v33 }
 0x131   :  { %v360_v10 = vrot.slane %v344_v60, %v1418_v30  ;;  %v372_v56 = vrot.slane %v344_v60, %v1318_v34  ;;  %v384_v32 = vrot.slane %v344_v60, %v1321_v35  ;;  %v396_v55 = vrot.slane %v344_v60, %v1324_v36 }
 0x132   :  { %v408_v14 = vrot.slane %v344_v60, %v1327_v37 }
 0x133   :  { %v361_v50 = vmul.f32 %v360_v10, %v1387_v15  ;;  %v363_v41 = vmul.f32 %v360_v10, %v1389_v16  ;;  %v365_v57 = vmul.f32 %v360_v10, %v1511_v2  ;;  %v367_v51 = vmul.f32 %v360_v10, %v1517_v28 }
 0x134   :  { %v373_v46 = vmul.f32 %v372_v56, %v1391_v17  ;;  %v375_v59 = vmul.f32 %v372_v56, %v1395_v19  ;;  %v377_v13 = vmul.f32 %v372_v56, %v1521_v0  ;;  %v379_v3 = vmul.f32 %v372_v56, %v1523_v39 }
 0x135   :  { %v362_v48 = vadd.f32 %v361_v50, %v1354_v52  ;;  %v364_v47 = vadd.f32 %v363_v41, %v1375_v5  ;;  %v366_v42 = vadd.f32 %v365_v57, %v1490_v58  ;;  %v368_v12 = vadd.f32 %v367_v51, %v1462_v40 }
 0x136   :  { %v385_v27 = vmul.f32 %v384_v32, %v1397_v20  ;;  %v387_v45 = vmul.f32 %v384_v32, %v1401_v22  ;;  %v389_v4 = vmul.f32 %v384_v32, %v1530_v24  ;;  %v391_v23 = vmul.f32 %v384_v32, %v1528_v11 }
 0x137   :  { %v374_v62 = vadd.f32 %v373_v46, %v362_v48  ;;  %v376_v61 = vadd.f32 %v375_v59, %v364_v47  ;;  %v378_v38 = vadd.f32 %v377_v13, %v366_v42  ;;  %v380_v33 = vadd.f32 %v379_v3, %v368_v12 }
 0x138   :  { %v397_v52 = vmul.f32 %v396_v55, %v1415_v29  ;;  %v399_v5 = vmul.f32 %v396_v55, %v1393_v18  ;;  %v401_v58 = vmul.f32 %v396_v55, %v1542_v43  ;;  %v403_v40 = vmul.f32 %v396_v55, %v1550_v9 }
 0x139   :  { %v386_v21 = vadd.f32 %v385_v27, %v374_v62  ;;  %v388_v60 = vadd.f32 %v387_v45, %v376_v61  ;;  %v390_v10 = vadd.f32 %v389_v4, %v378_v38  ;;  %v392_v56 = vadd.f32 %v391_v23, %v380_v33 }
 0x13a   :  { %v409_v50 = vmul.f32 %v408_v14, %v1420_v31  ;;  %v411_v32 = vmul.f32 %v408_v14, %v1426_v44  ;;  %v413_v41 = vmul.f32 %v408_v14, %v1536_v25  ;;  %v415_v57 = vmul.f32 %v408_v14, %v1555_v26 }
 0x13b   :  { %v398_v51 = vadd.f32 %v397_v52, %v386_v21  ;;  %v400_v46 = vadd.f32 %v399_v5, %v388_v60  ;;  %v402_v59 = vadd.f32 %v401_v58, %v390_v10  ;;  %v404_v13 = vadd.f32 %v403_v40, %v392_v56 }
 0x13d   :  { %v410_v3 = vadd.f32 %v409_v50, %v398_v51  ;;  %v412_v48 = vadd.f32 %v411_v32, %v400_v46  ;;  %v414_v47 = vadd.f32 %v413_v41, %v402_v59  ;;  %v416_v55 = vadd.f32 %v415_v57, %v404_v13 }
 0x13f   :  { %v967_v42 = vmul.f32 -1.442695, %v410_v3  ;;  %v968_v12 = vmul.f32 -1.442695, %v412_v48  ;;  %v969_v27 = vmul.f32 -1.442695, %v416_v55 }
 0x141   :  { %1068 = vpow2.f32 %v967_v42 }
 0x142   :  { %1070 = vpow2.f32 %v968_v12 }
 0x143   :  { %1072 = vpow2.f32 %v969_v27 }
 0x144   :  { %1074 = vtanh.f32 %v414_v47 }
 0x14b   :  { %v1069_v45 = vpop.eup %1068 }
 0x14c   :  { %v1071_v4 = vpop.eup %1070  ;;  %v420_v23 = vadd.f32 1.0, %v1069_v45 }
 0x14d   :  { %v426_v62 = vadd.f32 1.0, %v1071_v4  ;;  %v1073_v14 = vpop.eup %1072 }
 0x14e   :  { %1076 = vrcp.f32 %v420_v23  ;;  %v1075_v61 = vpop.eup %1074  ;;  %v433_v52 = vadd.f32 1.0, %v1073_v14 }
 0x14f   :  { %1078 = vrcp.f32 %v426_v62 }
 0x150   :  { %1080 = vrcp.f32 %v433_v52 }
 0x158   :  { %v1077_v38 = vpop.eup %1076 }
 0x159   :  { %v1079_v33 = vpop.eup %1078  ;;  %v437_v5 = vmul.f32 %v1077_v38, %v1075_v61 }
 0x15a   :  { %v436_v58 = vmul.f32 %v1079_v33, %v1596_v6  ;;  %v1081_v21 = vpop.eup %1080 }
 0x15c   :  { %v1629_v40 = vadd.f32 %v437_v5, %v436_v58 }
 0x15e   :  { %1082 = vtanh.f32 %v1629_v40 }
 0x168   :  { %v1083_v60 = vpop.eup %1082 }
 0x169   :  { %v440_v10 = vmul.f32 %v1083_v60, %v1081_v21 }
 0x16b   :  { %v456_v56 = vrot.slane %v440_v10, %v1418_v30  ;;  %v468_v50 = vrot.slane %v440_v10, %v1318_v34  ;;  %v480_v32 = vrot.slane %v440_v10, %v1321_v35  ;;  %v492_v41 = vrot.slane %v440_v10, %v1324_v36 }
 0x16c   :  { %v504_v57 = vrot.slane %v440_v10, %v1327_v37 }
 0x16d   :  { %v457_v6 = vmul.f32 %v456_v56, %v1387_v15  ;;  %v459_v51 = vmul.f32 %v456_v56, %v1389_v16  ;;  %v461_v46 = vmul.f32 %v456_v56, %v1511_v2  ;;  %v463_v59 = vmul.f32 %v456_v56, %v1517_v28 }
 0x16e   :  { %v469_v13 = vmul.f32 %v468_v50, %v1391_v17  ;;  %v471_v3 = vmul.f32 %v468_v50, %v1395_v19  ;;  %v473_v48 = vmul.f32 %v468_v50, %v1521_v0  ;;  %v475_v47 = vmul.f32 %v468_v50, %v1523_v39 }
 0x16f   :  { %v458_v55 = vadd.f32 %v457_v6, %v1356_v53  ;;  %v460_v42 = vadd.f32 %v459_v51, %v1377_v7  ;;  %v462_v12 = vadd.f32 %v461_v46, %v1493_v63  ;;  %v464_v27 = vadd.f32 %v463_v59, %v1465_v1 }
 0x170   :  { %v481_v45 = vmul.f32 %v480_v32, %v1397_v20  ;;  %v483_v4 = vmul.f32 %v480_v32, %v1401_v22  ;;  %v485_v23 = vmul.f32 %v480_v32, %v1530_v24  ;;  %v487_v62 = vmul.f32 %v480_v32, %v1528_v11 }
 0x171   :  { %v470_v14 = vadd.f32 %v469_v13, %v458_v55  ;;  %v472_v61 = vadd.f32 %v471_v3, %v460_v42  ;;  %v474_v38 = vadd.f32 %v473_v48, %v462_v12  ;;  %v476_v33 = vadd.f32 %v475_v47, %v464_v27 }
 0x172   :  { %v493_v53 = vmul.f32 %v492_v41, %v1415_v29  ;;  %v495_v7 = vmul.f32 %v492_v41, %v1393_v18  ;;  %v497_v63 = vmul.f32 %v492_v41, %v1542_v43  ;;  %v499_v1 = vmul.f32 %v492_v41, %v1550_v9 }
 0x173   :  { %v482_v52 = vadd.f32 %v481_v45, %v470_v14  ;;  %v484_v5 = vadd.f32 %v483_v4, %v472_v61  ;;  %v486_v58 = vadd.f32 %v485_v23, %v474_v38  ;;  %v488_v21 = vadd.f32 %v487_v62, %v476_v33 }
 0x174   :  { %v505_v60 = vmul.f32 %v504_v57, %v1420_v31  ;;  %v507_v10 = vmul.f32 %v504_v57, %v1426_v44  ;;  %v509_v56 = vmul.f32 %v504_v57, %v1536_v25  ;;  %v511_v50 = vmul.f32 %v504_v57, %v1555_v26 }
 0x175   :  { %v494_v32 = vadd.f32 %v493_v53, %v482_v52  ;;  %v496_v6 = vadd.f32 %v495_v7, %v484_v5  ;;  %v498_v51 = vadd.f32 %v497_v63, %v486_v58  ;;  %v500_v46 = vadd.f32 %v499_v1, %v488_v21 }
 0x177   :  { %v506_v59 = vadd.f32 %v505_v60, %v494_v32  ;;  %v508_v13 = vadd.f32 %v507_v10, %v496_v6  ;;  %v510_v3 = vadd.f32 %v509_v56, %v498_v51  ;;  %v512_v41 = vadd.f32 %v511_v50, %v500_v46 }
 0x179   :  { %v970_v48 = vmul.f32 -1.442695, %v506_v59  ;;  %v971_v47 = vmul.f32 -1.442695, %v508_v13  ;;  %v972_v55 = vmul.f32 -1.442695, %v512_v41 }
 0x17b   :  { %1084 = vpow2.f32 %v970_v48 }
 0x17c   :  { %1086 = vpow2.f32 %v971_v47 }
 0x17d   :  { %1088 = vpow2.f32 %v972_v55 }
 0x17e   :  { %1090 = vtanh.f32 %v510_v3  ;;  %v1832_v3 = vld [vmem:[#allocation14_spill] sm:$0xff] }
 0x185   :  { %v1085_v42 = vpop.eup %1084 }
 0x186   :  { %v1087_v12 = vpop.eup %1086  ;;  %v516_v27 = vadd.f32 1.0, %v1085_v42 }
 0x187   :  { %v522_v45 = vadd.f32 1.0, %v1087_v12  ;;  %v1089_v57 = vpop.eup %1088 }
 0x188   :  { %1092 = vrcp.f32 %v516_v27  ;;  %v1091_v4 = vpop.eup %1090  ;;  %v529_v14 = vadd.f32 1.0, %v1089_v57 }
 0x189   :  { %1094 = vrcp.f32 %v522_v45 }
 0x18a   :  { %1096 = vrcp.f32 %v529_v14 }
 0x192   :  { %v1093_v23 = vpop.eup %1092 }
 0x193   :  { %v1095_v62 = vpop.eup %1094  ;;  %v533_v61 = vmul.f32 %v1093_v23, %v1091_v4 }
 0x194   :  { %v532_v38 = vmul.f32 %v1095_v62, %v1629_v40  ;;  %v1097_v53 = vpop.eup %1096 }
 0x196   :  { %v1662_v33 = vadd.f32 %v533_v61, %v532_v38 }
 0x198   :  { %1098 = vtanh.f32 %v1662_v33 }
 0x1a2   :  { %v1099_v7 = vpop.eup %1098 }
 0x1a3   :  { %v536_v63 = vmul.f32 %v1099_v7, %v1097_v53 }
 0x1a5   :  { %v552_v1 = vrot.slane %v536_v63, %v1418_v30  ;;  %v564_v52 = vrot.slane %v536_v63, %v1318_v34  ;;  %v576_v5 = vrot.slane %v536_v63, %v1321_v35  ;;  %v588_v58 = vrot.slane %v536_v63, %v1324_v36 }
 0x1a6   :  { %v600_v21 = vrot.slane %v536_v63, %v1327_v37 }
 0x1a7   :  { %v553_v40 = vmul.f32 %v552_v1, %v1387_v15  ;;  %v555_v60 = vmul.f32 %v552_v1, %v1389_v16  ;;  %v557_v10 = vmul.f32 %v552_v1, %v1511_v2  ;;  %v559_v56 = vmul.f32 %v552_v1, %v1517_v28 }
 0x1a8   :  { %v565_v50 = vmul.f32 %v564_v52, %v1391_v17  ;;  %v567_v32 = vmul.f32 %v564_v52, %v1395_v19  ;;  %v569_v6 = vmul.f32 %v564_v52, %v1521_v0  ;;  %v571_v51 = vmul.f32 %v564_v52, %v1523_v39 }
 0x1a9   :  { %v554_v46 = vadd.f32 %v553_v40, %v1358_v54  ;;  %v556_v59 = vadd.f32 %v555_v60, %v1379_v8  ;;  %v558_v13 = vadd.f32 %v557_v10, %v1498_v49  ;;  %v560_v41 = vadd.f32 %v559_v56, %v1832_v3 }
 0x1aa   :  { %v577_v48 = vmul.f32 %v576_v5, %v1397_v20  ;;  %v579_v47 = vmul.f32 %v576_v5, %v1401_v22  ;;  %v581_v55 = vmul.f32 %v576_v5, %v1530_v24  ;;  %v583_v42 = vmul.f32 %v576_v5, %v1528_v11 }
 0x1ab   :  { %v566_v12 = vadd.f32 %v565_v50, %v554_v46  ;;  %v568_v27 = vadd.f32 %v567_v32, %v556_v59  ;;  %v570_v45 = vadd.f32 %v569_v6, %v558_v13  ;;  %v572_v57 = vadd.f32 %v571_v51, %v560_v41 }
 0x1ac   :  { %v589_v54 = vmul.f32 %v588_v58, %v1415_v29  ;;  %v591_v8 = vmul.f32 %v588_v58, %v1393_v18  ;;  %v593_v49 = vmul.f32 %v588_v58, %v1542_v43  ;;  %v595_v4 = vmul.f32 %v588_v58, %v1550_v9 }
 0x1ad   :  { %v578_v23 = vadd.f32 %v577_v48, %v566_v12  ;;  %v580_v62 = vadd.f32 %v579_v47, %v568_v27  ;;  %v582_v14 = vadd.f32 %v581_v55, %v570_v45  ;;  %v584_v61 = vadd.f32 %v583_v42, %v572_v57 }
 0x1ae   :  { %v601_v38 = vmul.f32 %v600_v21, %v1420_v31  ;;  %v603_v53 = vmul.f32 %v600_v21, %v1426_v44  ;;  %v605_v7 = vmul.f32 %v600_v21, %v1536_v25  ;;  %v607_v63 = vmul.f32 %v600_v21, %v1555_v26 }
 0x1af   :  { %v590_v1 = vadd.f32 %v589_v54, %v578_v23  ;;  %v592_v52 = vadd.f32 %v591_v8, %v580_v62  ;;  %v594_v5 = vadd.f32 %v593_v49, %v582_v14  ;;  %v596_v40 = vadd.f32 %v595_v4, %v584_v61 }
 0x1b1   :  { %v602_v60 = vadd.f32 %v601_v38, %v590_v1  ;;  %v604_v10 = vadd.f32 %v603_v53, %v592_v52  ;;  %v606_v56 = vadd.f32 %v605_v7, %v594_v5  ;;  %v608_v58 = vadd.f32 %v607_v63, %v596_v40  ;;  %v1833_v1 = vld [vmem:[#allocation8_spill] sm:$0xff]  ;;  %v1834_v5 = vld [vmem:[#allocation11_spill] sm:$0xff] }
 0x1b3   :  { %v973_v50 = vmul.f32 -1.442695, %v602_v60  ;;  %v974_v32 = vmul.f32 -1.442695, %v604_v10  ;;  %v975_v6 = vmul.f32 -1.442695, %v608_v58 }
 0x1b4   :  { %v1835_v60 = vld [vmem:[#allocation18_spill] sm:$0xff] }
 0x1b5   :  { %1100 = vpow2.f32 %v973_v50 }
 0x1b6   :  { %1102 = vpow2.f32 %v974_v32 }
 0x1b7   :  { %1104 = vpow2.f32 %v975_v6 }
 0x1b8   :  { %1106 = vtanh.f32 %v606_v56  ;;  %v1836_v56 = vld [vmem:[#allocation15_spill] sm:$0xff] }
 0x1bf   :  { %v1101_v51 = vpop.eup %1100 }
 0x1c0   :  { %v1103_v46 = vpop.eup %1102  ;;  %v612_v59 = vadd.f32 1.0, %v1101_v51 }
 0x1c1   :  { %v618_v13 = vadd.f32 1.0, %v1103_v46  ;;  %v1105_v21 = vpop.eup %1104 }
 0x1c2   :  { %1108 = vrcp.f32 %v612_v59  ;;  %v1107_v3 = vpop.eup %1106  ;;  %v625_v47 = vadd.f32 1.0, %v1105_v21 }
 0x1c3   :  { %1110 = vrcp.f32 %v618_v13 }
 0x1c4   :  { %1112 = vrcp.f32 %v625_v47 }
 0x1cc   :  { %v1109_v41 = vpop.eup %1108 }
 0x1cd   :  { %v1111_v48 = vpop.eup %1110  ;;  %v629_v55 = vmul.f32 %v1109_v41, %v1107_v3 }
 0x1ce   :  { %v628_v42 = vmul.f32 %v1111_v48, %v1662_v33  ;;  %v1113_v27 = vpop.eup %1112 }
 0x1d0   :  { %v1695_v12 = vadd.f32 %v629_v55, %v628_v42 }
 0x1d2   :  { %1114 = vtanh.f32 %v1695_v12 }
 0x1dc   :  { %v1115_v45 = vpop.eup %1114 }
 0x1dd   :  { %v632_v57 = vmul.f32 %v1115_v45, %v1113_v27 }
 0x1df   :  { %v648_v54 = vrot.slane %v632_v57, %v1418_v30  ;;  %v660_v8 = vrot.slane %v632_v57, %v1318_v34  ;;  %v672_v49 = vrot.slane %v632_v57, %v1321_v35  ;;  %v684_v4 = vrot.slane %v632_v57, %v1324_v36 }
 0x1e0   :  { %v696_v23 = vrot.slane %v632_v57, %v1327_v37 }
 0x1e1   :  { %v649_v33 = vmul.f32 %v648_v54, %v1387_v15  ;;  %v651_v62 = vmul.f32 %v648_v54, %v1389_v16  ;;  %v653_v14 = vmul.f32 %v648_v54, %v1511_v2  ;;  %v655_v61 = vmul.f32 %v648_v54, %v1517_v28 }
 0x1e2   :  { %v661_v38 = vmul.f32 %v660_v8, %v1391_v17  ;;  %v663_v53 = vmul.f32 %v660_v8, %v1395_v19  ;;  %v665_v7 = vmul.f32 %v660_v8, %v1521_v0  ;;  %v667_v63 = vmul.f32 %v660_v8, %v1523_v39 }
 0x1e3   :  { %v650_v52 = vadd.f32 %v649_v33, %v1833_v1  ;;  %v652_v40 = vadd.f32 %v651_v62, %v1834_v5  ;;  %v654_v10 = vadd.f32 %v653_v14, %v1835_v60  ;;  %v656_v58 = vadd.f32 %v655_v61, %v1836_v56 }
 0x1e4   :  { %v673_v50 = vmul.f32 %v672_v49, %v1397_v20  ;;  %v675_v32 = vmul.f32 %v672_v49, %v1401_v22  ;;  %v677_v6 = vmul.f32 %v672_v49, %v1530_v24  ;;  %v679_v51 = vmul.f32 %v672_v49, %v1528_v11 }
 0x1e5   :  { %v662_v46 = vadd.f32 %v661_v38, %v650_v52  ;;  %v664_v59 = vadd.f32 %v663_v53, %v652_v40  ;;  %v666_v13 = vadd.f32 %v665_v7, %v654_v10  ;;  %v668_v21 = vadd.f32 %v667_v63, %v656_v58 }
 0x1e6   :  { %v685_v3 = vmul.f32 %v684_v4, %v1415_v29  ;;  %v687_v41 = vmul.f32 %v684_v4, %v1393_v18  ;;  %v689_v48 = vmul.f32 %v684_v4, %v1542_v43  ;;  %v691_v47 = vmul.f32 %v684_v4, %v1550_v9 }
 0x1e7   :  { %v674_v55 = vadd.f32 %v673_v50, %v662_v46  ;;  %v676_v42 = vadd.f32 %v675_v32, %v664_v59  ;;  %v678_v27 = vadd.f32 %v677_v6, %v666_v13  ;;  %v680_v45 = vadd.f32 %v679_v51, %v668_v21 }
 0x1e8   :  { %v697_v57 = vmul.f32 %v696_v23, %v1420_v31  ;;  %v699_v54 = vmul.f32 %v696_v23, %v1426_v44  ;;  %v701_v8 = vmul.f32 %v696_v23, %v1536_v25  ;;  %v703_v49 = vmul.f32 %v696_v23, %v1555_v26 }
 0x1e9   :  { %v686_v33 = vadd.f32 %v685_v3, %v674_v55  ;;  %v688_v62 = vadd.f32 %v687_v41, %v676_v42  ;;  %v690_v14 = vadd.f32 %v689_v48, %v678_v27  ;;  %v692_v61 = vadd.f32 %v691_v47, %v680_v45 }
 0x1eb   :  { %v698_v38 = vadd.f32 %v697_v57, %v686_v33  ;;  %v700_v53 = vadd.f32 %v699_v54, %v688_v62  ;;  %v702_v7 = vadd.f32 %v701_v8, %v690_v14  ;;  %v704_v4 = vadd.f32 %v703_v49, %v692_v61  ;;  %v1837_v33 = vld [vmem:[#allocation9_spill] sm:$0xff]  ;;  %v1838_v14 = vld [vmem:[#allocation12_spill] sm:$0xff] }
 0x1ed   :  { %v976_v63 = vmul.f32 -1.442695, %v698_v38  ;;  %v977_v1 = vmul.f32 -1.442695, %v700_v53  ;;  %v978_v52 = vmul.f32 -1.442695, %v704_v4 }
 0x1ee   :  { %v1839_v38 = vld [vmem:[#allocation19_spill] sm:$0xff] }
 0x1ef   :  { %1116 = vpow2.f32 %v976_v63 }
 0x1f0   :  { %1118 = vpow2.f32 %v977_v1 }
 0x1f1   :  { %1120 = vpow2.f32 %v978_v52 }
 0x1f2   :  { %1122 = vtanh.f32 %v702_v7  ;;  %v1840_v7 = vld [vmem:[#allocation16_spill] sm:$0xff] }
 0x1f9   :  { %v1117_v5 = vpop.eup %1116 }
 0x1fa   :  { %v1119_v40 = vpop.eup %1118  ;;  %v708_v60 = vadd.f32 1.0, %v1117_v5 }
 0x1fb   :  { %v714_v10 = vadd.f32 1.0, %v1119_v40  ;;  %v1121_v23 = vpop.eup %1120 }
 0x1fc   :  { %1124 = vrcp.f32 %v708_v60  ;;  %v1123_v56 = vpop.eup %1122  ;;  %v721_v32 = vadd.f32 1.0, %v1121_v23 }
 0x1fd   :  { %1126 = vrcp.f32 %v714_v10 }
 0x1fe   :  { %1128 = vrcp.f32 %v721_v32 }
 0x206   :  { %v1125_v58 = vpop.eup %1124 }
 0x207   :  { %v1127_v50 = vpop.eup %1126  ;;  %v725_v6 = vmul.f32 %v1125_v58, %v1123_v56 }
 0x208   :  { %v724_v51 = vmul.f32 %v1127_v50, %v1695_v12  ;;  %v1129_v59 = vpop.eup %1128 }
 0x20a   :  { %v1728_v46 = vadd.f32 %v725_v6, %v724_v51 }
 0x20c   :  { %1130 = vtanh.f32 %v1728_v46 }
 0x216   :  { %v1131_v13 = vpop.eup %1130 }
 0x217   :  { %v728_v21 = vmul.f32 %v1131_v13, %v1129_v59 }
 0x219   :  { %v744_v3 = vrot.slane %v728_v21, %v1418_v30  ;;  %v756_v41 = vrot.slane %v728_v21, %v1318_v34  ;;  %v768_v48 = vrot.slane %v728_v21, %v1321_v35  ;;  %v780_v47 = vrot.slane %v728_v21, %v1324_v36 }
 0x21a   :  { %v792_v55 = vrot.slane %v728_v21, %v1327_v37 }
 0x21b   :  { %v745_v12 = vmul.f32 %v744_v3, %v1387_v15  ;;  %v747_v42 = vmul.f32 %v744_v3, %v1389_v16  ;;  %v749_v27 = vmul.f32 %v744_v3, %v1511_v2  ;;  %v751_v45 = vmul.f32 %v744_v3, %v1517_v28 }
 0x21c   :  { %v757_v57 = vmul.f32 %v756_v41, %v1391_v17  ;;  %v759_v54 = vmul.f32 %v756_v41, %v1395_v19  ;;  %v761_v8 = vmul.f32 %v756_v41, %v1521_v0  ;;  %v763_v49 = vmul.f32 %v756_v41, %v1523_v39 }
 0x21d   :  { %v746_v62 = vadd.f32 %v745_v12, %v1837_v33  ;;  %v748_v61 = vadd.f32 %v747_v42, %v1838_v14  ;;  %v750_v53 = vadd.f32 %v749_v27, %v1839_v38  ;;  %v752_v4 = vadd.f32 %v751_v45, %v1840_v7 }
 0x21e   :  { %v769_v63 = vmul.f32 %v768_v48, %v1397_v20  ;;  %v771_v1 = vmul.f32 %v768_v48, %v1401_v22  ;;  %v773_v52 = vmul.f32 %v768_v48, %v1530_v24  ;;  %v775_v5 = vmul.f32 %v768_v48, %v1528_v11 }
 0x21f   :  { %v758_v40 = vadd.f32 %v757_v57, %v746_v62  ;;  %v760_v60 = vadd.f32 %v759_v54, %v748_v61  ;;  %v762_v10 = vadd.f32 %v761_v8, %v750_v53  ;;  %v764_v23 = vadd.f32 %v763_v49, %v752_v4 }
 0x220   :  { %v781_v56 = vmul.f32 %v780_v47, %v1415_v29  ;;  %v783_v58 = vmul.f32 %v780_v47, %v1393_v18  ;;  %v785_v50 = vmul.f32 %v780_v47, %v1542_v43  ;;  %v787_v32 = vmul.f32 %v780_v47, %v1550_v9 }
 0x221   :  { %v770_v6 = vadd.f32 %v769_v63, %v758_v40  ;;  %v772_v51 = vadd.f32 %v771_v1, %v760_v60  ;;  %v774_v59 = vadd.f32 %v773_v52, %v762_v10  ;;  %v776_v13 = vadd.f32 %v775_v5, %v764_v23 }
 0x222   :  { %v793_v21 = vmul.f32 %v792_v55, %v1420_v31  ;;  %v795_v3 = vmul.f32 %v792_v55, %v1426_v44  ;;  %v797_v41 = vmul.f32 %v792_v55, %v1536_v25  ;;  %v799_v48 = vmul.f32 %v792_v55, %v1555_v26 }
 0x223   :  { %v782_v12 = vadd.f32 %v781_v56, %v770_v6  ;;  %v784_v42 = vadd.f32 %v783_v58, %v772_v51  ;;  %v786_v27 = vadd.f32 %v785_v50, %v774_v59  ;;  %v788_v45 = vadd.f32 %v787_v32, %v776_v13 }
 0x225   :  { %v794_v57 = vadd.f32 %v793_v21, %v782_v12  ;;  %v796_v54 = vadd.f32 %v795_v3, %v784_v42  ;;  %v798_v8 = vadd.f32 %v797_v41, %v786_v27  ;;  %v800_v47 = vadd.f32 %v799_v48, %v788_v45  ;;  %v1841_v3 = vld [vmem:[#allocation10_spill] sm:$0xff]  ;;  %v1842_v41 = vld [vmem:[#allocation13_spill] sm:$0xff]  ;;  %v1843_v48 = vld [vmem:[#allocation20_spill] sm:$0xff] }
 0x226   :  { %v1844_v12 = vld [vmem:[#allocation17_spill] sm:$0xff] }
 0x227   :  { %v979_v49 = vmul.f32 -1.442695, %v794_v57  ;;  %v980_v33 = vmul.f32 -1.442695, %v796_v54  ;;  %v981_v62 = vmul.f32 -1.442695, %v800_v47 }
 0x229   :  { %1132 = vpow2.f32 %v979_v49 }
 0x22a   :  { %1134 = vpow2.f32 %v980_v33 }
 0x22b   :  { %1136 = vpow2.f32 %v981_v62 }
 0x22c   :  { %1138 = vtanh.f32 %v798_v8 }
 0x233   :  { %v1133_v14 = vpop.eup %1132 }
 0x234   :  { %v1135_v61 = vpop.eup %1134  ;;  %v804_v38 = vadd.f32 1.0, %v1133_v14 }
 0x235   :  { %v810_v53 = vadd.f32 1.0, %v1135_v61  ;;  %v1137_v55 = vpop.eup %1136 }
 0x236   :  { %1140 = vrcp.f32 %v804_v38  ;;  %v1139_v7 = vpop.eup %1138  ;;  %v817_v1 = vadd.f32 1.0, %v1137_v55 }
 0x237   :  { %1142 = vrcp.f32 %v810_v53 }
 0x238   :  { %1144 = vrcp.f32 %v817_v1 }
 0x240   :  { %v1141_v4 = vpop.eup %1140 }
 0x241   :  { %v1143_v63 = vpop.eup %1142  ;;  %v821_v52 = vmul.f32 %v1141_v4, %v1139_v7 }
 0x242   :  { %v820_v5 = vmul.f32 %v1143_v63, %v1728_v46  ;;  %v1145_v60 = vpop.eup %1144 }
 0x244   :  { %v1761_v40 = vadd.f32 %v821_v52, %v820_v5 }
 0x246   :  { %1146 = vtanh.f32 %v1761_v40 }
 0x250   :  { %v1147_v10 = vpop.eup %1146 }
 0x251   :  { %v824_v23 = vmul.f32 %v1147_v10, %v1145_v60 }
 0x253   :  { %v840_v56 = vrot.slane %v824_v23, %v1418_v30  ;;  %v852_v58 = vrot.slane %v824_v23, %v1318_v34  ;;  %v864_v50 = vrot.slane %v824_v23, %v1321_v35  ;;  %v876_v32 = vrot.slane %v824_v23, %v1324_v36 }
 0x254   :  { %v888_v6 = vrot.slane %v824_v23, %v1327_v37 }
 0x255   :  { %v841_v46 = vmul.f32 %v840_v56, %v1387_v15  ;;  %v843_v51 = vmul.f32 %v840_v56, %v1389_v16  ;;  %v845_v59 = vmul.f32 %v840_v56, %v1511_v2  ;;  %v847_v13 = vmul.f32 %v840_v56, %v1517_v28 }
 0x256   :  { %v853_v21 = vmul.f32 %v852_v58, %v1391_v17  ;;  %v855_v30 = vmul.f32 %v852_v58, %v1395_v19  ;;  %v857_v34 = vmul.f32 %v852_v58, %v1521_v0  ;;  %v859_v35 = vmul.f32 %v852_v58, %v1523_v39 }
 0x257   :  { %v842_v36 = vadd.f32 %v841_v46, %v1841_v3  ;;  %v844_v37 = vadd.f32 %v843_v51, %v1842_v41  ;;  %v846_v15 = vadd.f32 %v845_v59, %v1843_v48  ;;  %v848_v16 = vadd.f32 %v847_v13, %v1844_v12 }
 0x258   :  { %v865_v2 = vmul.f32 %v864_v50, %v1397_v20  ;;  %v867_v28 = vmul.f32 %v864_v50, %v1401_v22  ;;  %v869_v17 = vmul.f32 %v864_v50, %v1530_v24  ;;  %v871_v19 = vmul.f32 %v864_v50, %v1528_v11 }
 0x259   :  { %v854_v42 = vadd.f32 %v853_v21, %v842_v36  ;;  %v856_v0 = vadd.f32 %v855_v30, %v844_v37  ;;  %v858_v27 = vadd.f32 %v857_v34, %v846_v15  ;;  %v860_v39 = vadd.f32 %v859_v35, %v848_v16 }
 0x25a   :  { %v877_v45 = vmul.f32 %v876_v32, %v1415_v29  ;;  %v879_v57 = vmul.f32 %v876_v32, %v1393_v18  ;;  %v881_v54 = vmul.f32 %v876_v32, %v1542_v43  ;;  %v883_v8 = vmul.f32 %v876_v32, %v1550_v9 }
 0x25b   :  { %v866_v47 = vadd.f32 %v865_v2, %v854_v42  ;;  %v868_v20 = vadd.f32 %v867_v28, %v856_v0  ;;  %v870_v49 = vadd.f32 %v869_v17, %v858_v27  ;;  %v872_v22 = vadd.f32 %v871_v19, %v860_v39 }
 0x25c   :  { %v889_v24 = vmul.f32 %v888_v6, %v1420_v31  ;;  %v891_v11 = vmul.f32 %v888_v6, %v1426_v44  ;;  %v893_v33 = vmul.f32 %v888_v6, %v1536_v25  ;;  %v895_v62 = vmul.f32 %v888_v6, %v1555_v26  ;;  %v932_v6 = vpop.permute.xlu1 %931 }
 0x25d   :  { %v878_v14 = vadd.f32 %v877_v45, %v866_v47  ;;  %v880_v29 = vadd.f32 %v879_v57, %v868_v20  ;;  %v882_v61 = vadd.f32 %v881_v54, %v870_v49  ;;  %v884_v18 = vadd.f32 %v883_v8, %v872_v22 }
 0x25e   :  { %v943_v35 = vstv %s1817_s5 }
 0x25f   :  { %v890_v38 = vadd.f32 %v889_v24, %v878_v14  ;;  %v892_v43 = vadd.f32 %v891_v11, %v880_v29  ;;  %v894_v53 = vadd.f32 %v893_v33, %v882_v61  ;;  %v896_v9 = vadd.f32 %v895_v62, %v884_v18 }
 0x261   :  { %v982_v55 = vmul.f32 -1.442695, %v890_v38  ;;  %v983_v7 = vmul.f32 -1.442695, %v892_v43  ;;  %v984_v4 = vmul.f32 -1.442695, %v896_v9 }
 0x263   :  { %1148 = vpow2.f32 %v982_v55 }
 0x264   :  { %1150 = vpow2.f32 %v983_v7 }
 0x265   :  { %1152 = vpow2.f32 %v984_v4 }
 0x266   :  { %1154 = vtanh.f32 %v894_v53 }
 0x26d   :  { %v1149_v31 = vpop.eup %1148 }
 0x26e   :  { %v1151_v63 = vpop.eup %1150  ;;  %v900_v44 = vadd.f32 1.0, %v1149_v31 }
 0x26f   :  { %v906_v25 = vadd.f32 1.0, %v1151_v63  ;;  %v1153_v26 = vpop.eup %1152 }
 0x270   :  { %1156 = vrcp.f32 %v900_v44  ;;  %v1155_v1 = vpop.eup %1154  ;;  %v913_v60 = vadd.f32 1.0, %v1153_v26 }
 0x271   :  { %1158 = vrcp.f32 %v906_v25 }
 0x272   :  { %1160 = vrcp.f32 %v913_v60 }
 0x27a   :  { %v1157_v52 = vpop.eup %1156 }
 0x27b   :  { %v1159_v5 = vpop.eup %1158  ;;  %v917_v10 = vmul.f32 %v1157_v52, %v1155_v1 }
 0x27c   :  { %v916_v23 = vmul.f32 %v1159_v5, %v1761_v40  ;;  %v1161_v58 = vpop.eup %1160 }
 0x27e   :  { %v918_v56 = vadd.f32 %v917_v10, %v916_v23 }
 0x280   :  { %1162 = vtanh.f32 %v918_v56  ;;  %923 = vst.msk [vmem:[#allocation3] sm:$0x1f] %vm29_vm0, %v918_v56 }
 0x28a   :  { %v1163_v50 = vpop.eup %1162 }
 0x28b   :  { %v920_v32 = vmul.f32 %v1163_v50, %v1161_v58 }
 0x28d   :  { %922 = vst.msk [vmem:[#allocation2] sm:$0x1f] %vm29_vm0, %v920_v32  ;;  %v927_v46 = vmax.f32 %v920_v32, 0.0 }
 0x28f   :  { %v934_v51 = vmul.f32 %v932_v6, %v927_v46 }
 0x291   :  { %v935_v59 = vsel %vm29_vm0, %v934_v51, 0.0 }
 0x292   :  { %v936_v13 = vrot.slane %v935_v59, 4 }
 0x294   :  { %v937_v21 = vadd.f32 %v936_v13, %v935_v59 }
 0x296   :  { %v938_v30 = vrot.slane %v937_v21, 2 }
 0x298   :  { %v939_v34 = vadd.f32 %v938_v30, %v937_v21 }
 0x29a   :  { %v940_v40 = vrot.slane %v939_v34, 1 }
 0x29c   :  { %v941_v3 = vadd.f32 %v940_v40, %v939_v34 }
 0x29e   :  { %v944_v36 = vadd.f32 %v943_v35, %v941_v3 }
 0x2a0   :  { %946 = vst.msk [vmem:[#allocation5] sm:$0x1] %vm945_vm1, %v944_v36 }
 0x2a1   :  { %1175 = shalt.err (!%p1172_p4)
}
 0x2a2   :  { %s1176_s10 = scalar_lea.hbm %s1818_s6, 16 }
 0x2a3   :  { %p1177_p5 = scmp.ne.s32.totalorder %s1818_s6, %s1176_s10  ;;  %p1180_p6 = scmp.lt.u32.totalorder %s1176_s10, %s1818_s6 }
 0x2a5   :  { %p1182_p7 = pnand %p1180_p6, %p1177_p5 }
 0x2a7   :  { %1185 = shalt.err (!%p1182_p7)
}
 0x2a8   :  { %956 = dma.vmem_to_hbm [thread:$0]  %s954_s29, 16, %s1818_s6, [#allocation6]  }
 0x2a9   :  { %1186 = dma.done.wait [#allocation6], 16  }
 0x2aa   :  { %1187 = vsyncadd [#allocation6], 4294967280 }
 0x2ab   :  { %960 = vsyncpa [#allocation6], 1 }

</bundles_post_ra>
